<compile_context>
chip_gen: v7x
topology: tpu7x:2x2x1
jax: 0.10.0
libtpu: 0.0.40
codegen_flags: <defaults>
</compile_context>

<pallas_src>
import jax
import jax.numpy as jnp
from jax.experimental import pallas as pl
from jax.experimental.pallas import tpu as pltpu


# ----------------------------------------------------------------------------
# Fused PointerNet kernel
# ----------------------------------------------------------------------------
def _lstm_unrolled(xp, wh, T, B, H, h0, c0, g_lane_mask, lens=None):
    """Unrolled single-layer LSTM (PyTorch gate order i, f, g, o).

    xp : (T*B, 4H) hoisted input projection (x @ Wx + b_ih + b_hh), row t*B + b.
    wh : (H, 4H)   recurrent weight (only matmul left inside the serial loop).
    Returns (per-step h list, h_final, c_final). If `lens` (B,1) is given, the
    final state is the state at step lens[b]-1 (packed-sequence semantics).
    """
    h, c = h0, c0
    h_fin, c_fin = h0, c0
    hs = []
    for t in range(T):
        gates = xp[t * B:(t + 1) * B, :] + jnp.dot(
            h, wh, preferred_element_type=jnp.float32)            # (B, 4H)
        # One sigmoid + one tanh over the full 4H-lane tile; pick tanh lanes for g.
        act = jnp.where(g_lane_mask, jnp.tanh(gates), jax.nn.sigmoid(gates))
        i_g = act[:, 0 * H:1 * H]
        f_g = act[:, 1 * H:2 * H]
        g_g = act[:, 2 * H:3 * H]
        o_g = act[:, 3 * H:4 * H]
        c = f_g * c + i_g * g_g
        h = o_g * jnp.tanh(c)
        hs.append(h)
        if lens is not None:
            sel = lens == (t + 1)                                  # (B, 1) bool
            h_fin = jnp.where(sel, h, h_fin)
            c_fin = jnp.where(sel, c, c_fin)
        else:
            h_fin, c_fin = h, c
    return hs, h_fin, c_fin


def pointer_net_kernel(len_ref, xe_ref, xd_ref,
                       wxe_ref, whe_ref, be_ref,
                       wxd_ref, whd_ref, bd_ref,
                       out_ref):
    B, Tt, S = out_ref.shape
    H = whe_ref.shape[0]

    lens = len_ref[...]                                            # (B, 1) int32

    # ---- hoisted input projections: one lane-dense MXU matmul per LSTM ----
    xpe = jnp.dot(xe_ref[...], wxe_ref[...],
                  preferred_element_type=jnp.float32) + be_ref[...]    # (S*B, 4H)
    xpd = jnp.dot(xd_ref[...], wxd_ref[...],
                  preferred_element_type=jnp.float32) + bd_ref[...]    # (Tt*B, 4H)

    # Lane mask for the g (tanh) gate, hoisted out of the time loops.
    lane = jax.lax.broadcasted_iota(jnp.int32, (B, 4 * H), 1)
    g_lane_mask = (lane >= 2 * H) & (lane < 3 * H)

    zeros = jnp.zeros((B, H), jnp.float32)

    # Encoder: final (h, c) taken at t == input_len[b]-1 (pack_padded_sequence).
    enc_hs, h_fin, c_fin = _lstm_unrolled(
        xpe, whe_ref[...], S, B, H, zeros, zeros, g_lane_mask, lens=lens)
    # Decoder, seeded with the encoder's packed final state.
    dec_hs, _, _ = _lstm_unrolled(
        xpd, whd_ref[...], Tt, B, H, h_fin, c_fin, g_lane_mask, lens=None)

    enc_H = jnp.stack(enc_hs, axis=0)                              # (S, B, H)
    dec_H = jnp.stack(dec_hs, axis=0)                              # (Tt, B, H)

    # ---- attention: masked softmax of bmm(dec_h, enc_h^T) over the src axis ----
    col = jax.lax.broadcasted_iota(jnp.int32, (Tt, S), 1)
    for b in range(B):                                             # B=4, static
        tgt_b = dec_H[:, b, :]                                     # (Tt, H)
        mem_b = enc_H[:, b, :]                                     # (S, H)
        score = jax.lax.dot_general(
            tgt_b, mem_b, (((1,), (1,)), ((), ())),
            preferred_element_type=jnp.float32)                    # (Tt, S)
        l_b = lens[b:b + 1, 0:1]                                   # (1, 1)
        masked = jnp.where(col < l_b, score, -1e30)                # finite: no NaN
        m = jnp.max(masked, axis=-1, keepdims=True)
        e = jnp.exp(masked - m)
        out_ref[b] = e / jnp.sum(e, axis=-1, keepdims=True)


# ----------------------------------------------------------------------------
# Wrapper
# ----------------------------------------------------------------------------
def pointer_net_forward(params, inp, input_len, outp, output_len):
    """inp: (B, S, I), outp: (B, Tt, I), input_len/output_len: (B,) int.
    Returns align_score: (B, Tt, S). (output_len is unused, as in PyTorch.)"""
    del output_len
    B, S, _ = inp.shape
    _, Tt, _ = outp.shape
    wxe, whe, be = params['enc']
    wxd, whd, bd = params['dec']

    # Time-major flattened inputs (row index t*B + b): lets the kernel do the whole
    # input projection as one matmul and slice each step with a static row slice.
    x_enc = jnp.transpose(inp, (1, 0, 2)).reshape(S * B, inp.shape[2])
    x_dec = jnp.transpose(outp, (1, 0, 2)).reshape(Tt * B, outp.shape[2])
    lens = input_len.astype(jnp.int32).reshape(B, 1)

    vmem = pl.BlockSpec(memory_space=pltpu.MemorySpace.VMEM)
    return pl.pallas_call(
        pointer_net_kernel,
        out_shape=jax.ShapeDtypeStruct((B, Tt, S), jnp.float32),
        in_specs=[vmem] * 9,
        out_specs=vmem,
    )(lens, x_enc, x_dec, wxe, whe, be, wxd, whd, bd)


# ----------------------------------------------------------------------------
# Parameter init (matches PyTorch LSTM uniform(-1/sqrt(H), 1/sqrt(H)))
# ----------------------------------------------------------------------------
def init_lstm_params(key, input_size, hidden_size):
    k = 1.0 / float(hidden_size) ** 0.5
    k0, k1, k2, k3 = jax.random.split(key, 4)
    wx = jax.random.uniform(k0, (input_size, 4 * hidden_size), jnp.float32, -k, k)
    wh = jax.random.uniform(k1, (hidden_size, 4 * hidden_size), jnp.float32, -k, k)
    b_ih = jax.random.uniform(k2, (4 * hidden_size,), jnp.float32, -k, k)
    b_hh = jax.random.uniform(k3, (4 * hidden_size,), jnp.float32, -k, k)
    b = (b_ih + b_hh).reshape(1, 4 * hidden_size)
    return wx, wh, b


if __name__ == "__main__":
    key = jax.random.PRNGKey(0)
    B, S, Tt = 4, 8, 8
    I, H = 8, 32

    k_enc, k_dec, k_in, k_out = jax.random.split(key, 4)
    params = {
        'enc': init_lstm_params(k_enc, I, H),
        'dec': init_lstm_params(k_dec, I, H),
    }

    inp = jax.random.uniform(k_in, (B, S, I), jnp.float32)
    outp = jax.random.uniform(k_out, (B, Tt, I), jnp.float32)
    # pack_padded_sequence requires lengths sorted in decreasing order, all >= 1.
    input_len = jnp.array([8, 7, 6, 5], jnp.int32)
    output_len = jnp.array([8, 8, 8, 8], jnp.int32)

    fwd = jax.jit(pointer_net_forward)
    align = fwd(params, inp, input_len, outp, output_len)
    align = jax.block_until_ready(align)

    assert align.shape == (B, Tt, S)
    # rows of the softmax sum to 1 over the source axis
    assert bool(jnp.allclose(jnp.sum(align, axis=-1), 1.0, atol=1e-5))
    # masked (padded) source positions receive zero probability
    assert bool(jnp.all(align[1, :, 7] == 0.0))
    print("KERNEL_OK")
</pallas_src>

<mosaic_0001>
module attributes {stable_mosaic.version = 11 : i64} {
  func.func @pointer_net_kernel(%arg0: memref<4x1xi32, #tpu.memory_space<vmem>>, %arg1: memref<32x8xf32, #tpu.memory_space<vmem>>, %arg2: memref<32x8xf32, #tpu.memory_space<vmem>>, %arg3: memref<8x128xf32, #tpu.memory_space<vmem>>, %arg4: memref<32x128xf32, #tpu.memory_space<vmem>>, %arg5: memref<1x128xf32, #tpu.memory_space<vmem>>, %arg6: memref<8x128xf32, #tpu.memory_space<vmem>>, %arg7: memref<32x128xf32, #tpu.memory_space<vmem>>, %arg8: memref<1x128xf32, #tpu.memory_space<vmem>>, %arg9: memref<4x8x8xf32, #tpu.memory_space<vmem>>) attributes {dimension_semantics = [], scalar_prefetch = 0 : i64, scratch_operands = 0 : i64, tpu.core_type = #tpu.core_type<tc>} {
    %c0 = arith.constant 0 : index
    %c0_0 = arith.constant 0 : index
    %0 = vector.load %arg0[%c0, %c0_0] : memref<4x1xi32, #tpu.memory_space<vmem>>, vector<4x1xi32>
    %c0_1 = arith.constant 0 : index
    %c0_2 = arith.constant 0 : index
    %1 = vector.load %arg1[%c0_1, %c0_2] : memref<32x8xf32, #tpu.memory_space<vmem>>, vector<32x8xf32>
    %c0_3 = arith.constant 0 : index
    %c0_4 = arith.constant 0 : index
    %2 = vector.load %arg3[%c0_3, %c0_4] : memref<8x128xf32, #tpu.memory_space<vmem>>, vector<8x128xf32>
    %cst = arith.constant dense<0.000000e+00> : vector<32x128xf32>
    %3 = tpu.matmul %1, %2, %cst {dimension_numbers = #tpu.dot_dimension_numbers<[1], [0], [0], [1], [0, 0, 1, 1], [], []>} : vector<32x8xf32>, vector<8x128xf32>, vector<32x128xf32> -> vector<32x128xf32>
    %c0_5 = arith.constant 0 : index
    %c0_6 = arith.constant 0 : index
    %4 = vector.load %arg5[%c0_5, %c0_6] : memref<1x128xf32, #tpu.memory_space<vmem>>, vector<1x128xf32>
    %5 = vector.broadcast %4 : vector<1x128xf32> to vector<32x128xf32>
    %6 = arith.addf %3, %5 : vector<32x128xf32>
    %c0_7 = arith.constant 0 : index
    %c0_8 = arith.constant 0 : index
    %7 = vector.load %arg2[%c0_7, %c0_8] : memref<32x8xf32, #tpu.memory_space<vmem>>, vector<32x8xf32>
    %c0_9 = arith.constant 0 : index
    %c0_10 = arith.constant 0 : index
    %8 = vector.load %arg6[%c0_9, %c0_10] : memref<8x128xf32, #tpu.memory_space<vmem>>, vector<8x128xf32>
    %cst_11 = arith.constant dense<0.000000e+00> : vector<32x128xf32>
    %9 = tpu.matmul %7, %8, %cst_11 {dimension_numbers = #tpu.dot_dimension_numbers<[1], [0], [0], [1], [0, 0, 1, 1], [], []>} : vector<32x8xf32>, vector<8x128xf32>, vector<32x128xf32> -> vector<32x128xf32>
    %c0_12 = arith.constant 0 : index
    %c0_13 = arith.constant 0 : index
    %10 = vector.load %arg8[%c0_12, %c0_13] : memref<1x128xf32, #tpu.memory_space<vmem>>, vector<1x128xf32>
    %11 = vector.broadcast %10 : vector<1x128xf32> to vector<32x128xf32>
    %12 = arith.addf %9, %11 : vector<32x128xf32>
    %13 = tpu.iota {dimensions = array<i32: 1>} : vector<4x128xi32>
    %c64_i32 = arith.constant 64 : i32
    %14 = vector.broadcast %c64_i32 : i32 to vector<4x128xi32>
    %15 = arith.cmpi sge, %13, %14 : vector<4x128xi32>
    %c96_i32 = arith.constant 96 : i32
    %16 = vector.broadcast %c96_i32 : i32 to vector<4x128xi32>
    %17 = arith.cmpi slt, %13, %16 : vector<4x128xi32>
    %18 = arith.andi %15, %17 : vector<4x128xi1>
    %cst_14 = arith.constant 0.000000e+00 : f32
    %19 = vector.broadcast %cst_14 : f32 to vector<4x32xf32>
    %c0_15 = arith.constant 0 : index
    %c0_16 = arith.constant 0 : index
    %20 = vector.load %arg4[%c0_15, %c0_16] : memref<32x128xf32, #tpu.memory_space<vmem>>, vector<32x128xf32>
    %21 = vector.extract_strided_slice %6 {offsets = [0, 0], sizes = [4, 128], strides = [1, 1]} : vector<32x128xf32> to vector<4x128xf32>
    %cst_17 = arith.constant dense<0.000000e+00> : vector<4x128xf32>
    %22 = tpu.matmul %19, %20, %cst_17 {dimension_numbers = #tpu.dot_dimension_numbers<[1], [0], [0], [1], [0, 0, 1, 1], [], []>} : vector<4x32xf32>, vector<32x128xf32>, vector<4x128xf32> -> vector<4x128xf32>
    %23 = arith.addf %21, %22 : vector<4x128xf32>
    %24 = math.tanh %23 : vector<4x128xf32>
    %25 = arith.negf %23 : vector<4x128xf32>
    %26 = math.exp %25 : vector<4x128xf32>
    %cst_18 = arith.constant 1.000000e+00 : f32
    %27 = vector.broadcast %cst_18 : f32 to vector<4x128xf32>
    %28 = arith.addf %27, %26 : vector<4x128xf32>
    %29 = arith.divf %27, %28 : vector<4x128xf32>
    %30 = arith.select %18, %24, %29 : vector<4x128xi1>, vector<4x128xf32>
    %31 = vector.extract_strided_slice %30 {offsets = [0, 0], sizes = [4, 32], strides = [1, 1]} : vector<4x128xf32> to vector<4x32xf32>
    %32 = vector.extract_strided_slice %30 {offsets = [0, 32], sizes = [4, 32], strides = [1, 1]} : vector<4x128xf32> to vector<4x32xf32>
    %33 = vector.extract_strided_slice %30 {offsets = [0, 64], sizes = [4, 32], strides = [1, 1]} : vector<4x128xf32> to vector<4x32xf32>
    %34 = vector.extract_strided_slice %30 {offsets = [0, 96], sizes = [4, 32], strides = [1, 1]} : vector<4x128xf32> to vector<4x32xf32>
    %35 = arith.mulf %32, %19 : vector<4x32xf32>
    %36 = arith.mulf %31, %33 : vector<4x32xf32>
    %37 = arith.addf %35, %36 : vector<4x32xf32>
    %38 = math.tanh %37 : vector<4x32xf32>
    %39 = arith.mulf %34, %38 : vector<4x32xf32>
    %c1_i32 = arith.constant 1 : i32
    %40 = vector.broadcast %c1_i32 : i32 to vector<4x1xi32>
    %41 = arith.cmpi eq, %0, %40 : vector<4x1xi32>
    %42 = vector.shape_cast %41 : vector<4x1xi1> to vector<4x1xi1>
    %43 = vector.broadcast %42 : vector<4x1xi1> to vector<4x32xi1>
    %44 = arith.select %43, %39, %19 : vector<4x32xi1>, vector<4x32xf32>
    %45 = vector.shape_cast %41 : vector<4x1xi1> to vector<4x1xi1>
    %46 = vector.broadcast %45 : vector<4x1xi1> to vector<4x32xi1>
    %47 = arith.select %46, %37, %19 : vector<4x32xi1>, vector<4x32xf32>
    %48 = vector.extract_strided_slice %6 {offsets = [4, 0], sizes = [4, 128], strides = [1, 1]} : vector<32x128xf32> to vector<4x128xf32>
    %cst_19 = arith.constant dense<0.000000e+00> : vector<4x128xf32>
    %49 = tpu.matmul %39, %20, %cst_19 {dimension_numbers = #tpu.dot_dimension_numbers<[1], [0], [0], [1], [0, 0, 1, 1], [], []>} : vector<4x32xf32>, vector<32x128xf32>, vector<4x128xf32> -> vector<4x128xf32>
    %50 = arith.addf %48, %49 : vector<4x128xf32>
    %51 = math.tanh %50 : vector<4x128xf32>
    %52 = arith.negf %50 : vector<4x128xf32>
    %53 = math.exp %52 : vector<4x128xf32>
    %cst_20 = arith.constant 1.000000e+00 : f32
    %54 = vector.broadcast %cst_20 : f32 to vector<4x128xf32>
    %55 = arith.addf %54, %53 : vector<4x128xf32>
    %56 = arith.divf %54, %55 : vector<4x128xf32>
    %57 = arith.select %18, %51, %56 : vector<4x128xi1>, vector<4x128xf32>
    %58 = vector.extract_strided_slice %57 {offsets = [0, 0], sizes = [4, 32], strides = [1, 1]} : vector<4x128xf32> to vector<4x32xf32>
    %59 = vector.extract_strided_slice %57 {offsets = [0, 32], sizes = [4, 32], strides = [1, 1]} : vector<4x128xf32> to vector<4x32xf32>
    %60 = vector.extract_strided_slice %57 {offsets = [0, 64], sizes = [4, 32], strides = [1, 1]} : vector<4x128xf32> to vector<4x32xf32>
    %61 = vector.extract_strided_slice %57 {offsets = [0, 96], sizes = [4, 32], strides = [1, 1]} : vector<4x128xf32> to vector<4x32xf32>
    %62 = arith.mulf %59, %37 : vector<4x32xf32>
    %63 = arith.mulf %58, %60 : vector<4x32xf32>
    %64 = arith.addf %62, %63 : vector<4x32xf32>
    %65 = math.tanh %64 : vector<4x32xf32>
    %66 = arith.mulf %61, %65 : vector<4x32xf32>
    %c2_i32 = arith.constant 2 : i32
    %67 = vector.broadcast %c2_i32 : i32 to vector<4x1xi32>
    %68 = arith.cmpi eq, %0, %67 : vector<4x1xi32>
    %69 = vector.shape_cast %68 : vector<4x1xi1> to vector<4x1xi1>
    %70 = vector.broadcast %69 : vector<4x1xi1> to vector<4x32xi1>
    %71 = arith.select %70, %66, %44 : vector<4x32xi1>, vector<4x32xf32>
    %72 = vector.shape_cast %68 : vector<4x1xi1> to vector<4x1xi1>
    %73 = vector.broadcast %72 : vector<4x1xi1> to vector<4x32xi1>
    %74 = arith.select %73, %64, %47 : vector<4x32xi1>, vector<4x32xf32>
    %75 = vector.extract_strided_slice %6 {offsets = [8, 0], sizes = [4, 128], strides = [1, 1]} : vector<32x128xf32> to vector<4x128xf32>
    %cst_21 = arith.constant dense<0.000000e+00> : vector<4x128xf32>
    %76 = tpu.matmul %66, %20, %cst_21 {dimension_numbers = #tpu.dot_dimension_numbers<[1], [0], [0], [1], [0, 0, 1, 1], [], []>} : vector<4x32xf32>, vector<32x128xf32>, vector<4x128xf32> -> vector<4x128xf32>
    %77 = arith.addf %75, %76 : vector<4x128xf32>
    %78 = math.tanh %77 : vector<4x128xf32>
    %79 = arith.negf %77 : vector<4x128xf32>
    %80 = math.exp %79 : vector<4x128xf32>
    %cst_22 = arith.constant 1.000000e+00 : f32
    %81 = vector.broadcast %cst_22 : f32 to vector<4x128xf32>
    %82 = arith.addf %81, %80 : vector<4x128xf32>
    %83 = arith.divf %81, %82 : vector<4x128xf32>
    %84 = arith.select %18, %78, %83 : vector<4x128xi1>, vector<4x128xf32>
    %85 = vector.extract_strided_slice %84 {offsets = [0, 0], sizes = [4, 32], strides = [1, 1]} : vector<4x128xf32> to vector<4x32xf32>
    %86 = vector.extract_strided_slice %84 {offsets = [0, 32], sizes = [4, 32], strides = [1, 1]} : vector<4x128xf32> to vector<4x32xf32>
    %87 = vector.extract_strided_slice %84 {offsets = [0, 64], sizes = [4, 32], strides = [1, 1]} : vector<4x128xf32> to vector<4x32xf32>
    %88 = vector.extract_strided_slice %84 {offsets = [0, 96], sizes = [4, 32], strides = [1, 1]} : vector<4x128xf32> to vector<4x32xf32>
    %89 = arith.mulf %86, %64 : vector<4x32xf32>
    %90 = arith.mulf %85, %87 : vector<4x32xf32>
    %91 = arith.addf %89, %90 : vector<4x32xf32>
    %92 = math.tanh %91 : vector<4x32xf32>
    %93 = arith.mulf %88, %92 : vector<4x32xf32>
    %c3_i32 = arith.constant 3 : i32
    %94 = vector.broadcast %c3_i32 : i32 to vector<4x1xi32>
    %95 = arith.cmpi eq, %0, %94 : vector<4x1xi32>
    %96 = vector.shape_cast %95 : vector<4x1xi1> to vector<4x1xi1>
    %97 = vector.broadcast %96 : vector<4x1xi1> to vector<4x32xi1>
    %98 = arith.select %97, %93, %71 : vector<4x32xi1>, vector<4x32xf32>
    %99 = vector.shape_cast %95 : vector<4x1xi1> to vector<4x1xi1>
    %100 = vector.broadcast %99 : vector<4x1xi1> to vector<4x32xi1>
    %101 = arith.select %100, %91, %74 : vector<4x32xi1>, vector<4x32xf32>
    %102 = vector.extract_strided_slice %6 {offsets = [12, 0], sizes = [4, 128], strides = [1, 1]} : vector<32x128xf32> to vector<4x128xf32>
    %cst_23 = arith.constant dense<0.000000e+00> : vector<4x128xf32>
    %103 = tpu.matmul %93, %20, %cst_23 {dimension_numbers = #tpu.dot_dimension_numbers<[1], [0], [0], [1], [0, 0, 1, 1], [], []>} : vector<4x32xf32>, vector<32x128xf32>, vector<4x128xf32> -> vector<4x128xf32>
    %104 = arith.addf %102, %103 : vector<4x128xf32>
    %105 = math.tanh %104 : vector<4x128xf32>
    %106 = arith.negf %104 : vector<4x128xf32>
    %107 = math.exp %106 : vector<4x128xf32>
    %cst_24 = arith.constant 1.000000e+00 : f32
    %108 = vector.broadcast %cst_24 : f32 to vector<4x128xf32>
    %109 = arith.addf %108, %107 : vector<4x128xf32>
    %110 = arith.divf %108, %109 : vector<4x128xf32>
    %111 = arith.select %18, %105, %110 : vector<4x128xi1>, vector<4x128xf32>
    %112 = vector.extract_strided_slice %111 {offsets = [0, 0], sizes = [4, 32], strides = [1, 1]} : vector<4x128xf32> to vector<4x32xf32>
    %113 = vector.extract_strided_slice %111 {offsets = [0, 32], sizes = [4, 32], strides = [1, 1]} : vector<4x128xf32> to vector<4x32xf32>
    %114 = vector.extract_strided_slice %111 {offsets = [0, 64], sizes = [4, 32], strides = [1, 1]} : vector<4x128xf32> to vector<4x32xf32>
    %115 = vector.extract_strided_slice %111 {offsets = [0, 96], sizes = [4, 32], strides = [1, 1]} : vector<4x128xf32> to vector<4x32xf32>
    %116 = arith.mulf %113, %91 : vector<4x32xf32>
    %117 = arith.mulf %112, %114 : vector<4x32xf32>
    %118 = arith.addf %116, %117 : vector<4x32xf32>
    %119 = math.tanh %118 : vector<4x32xf32>
    %120 = arith.mulf %115, %119 : vector<4x32xf32>
    %c4_i32 = arith.constant 4 : i32
    %121 = vector.broadcast %c4_i32 : i32 to vector<4x1xi32>
    %122 = arith.cmpi eq, %0, %121 : vector<4x1xi32>
    %123 = vector.shape_cast %122 : vector<4x1xi1> to vector<4x1xi1>
    %124 = vector.broadcast %123 : vector<4x1xi1> to vector<4x32xi1>
    %125 = arith.select %124, %120, %98 : vector<4x32xi1>, vector<4x32xf32>
    %126 = vector.shape_cast %122 : vector<4x1xi1> to vector<4x1xi1>
    %127 = vector.broadcast %126 : vector<4x1xi1> to vector<4x32xi1>
    %128 = arith.select %127, %118, %101 : vector<4x32xi1>, vector<4x32xf32>
    %129 = vector.extract_strided_slice %6 {offsets = [16, 0], sizes = [4, 128], strides = [1, 1]} : vector<32x128xf32> to vector<4x128xf32>
    %cst_25 = arith.constant dense<0.000000e+00> : vector<4x128xf32>
    %130 = tpu.matmul %120, %20, %cst_25 {dimension_numbers = #tpu.dot_dimension_numbers<[1], [0], [0], [1], [0, 0, 1, 1], [], []>} : vector<4x32xf32>, vector<32x128xf32>, vector<4x128xf32> -> vector<4x128xf32>
    %131 = arith.addf %129, %130 : vector<4x128xf32>
    %132 = math.tanh %131 : vector<4x128xf32>
    %133 = arith.negf %131 : vector<4x128xf32>
    %134 = math.exp %133 : vector<4x128xf32>
    %cst_26 = arith.constant 1.000000e+00 : f32
    %135 = vector.broadcast %cst_26 : f32 to vector<4x128xf32>
    %136 = arith.addf %135, %134 : vector<4x128xf32>
    %137 = arith.divf %135, %136 : vector<4x128xf32>
    %138 = arith.select %18, %132, %137 : vector<4x128xi1>, vector<4x128xf32>
    %139 = vector.extract_strided_slice %138 {offsets = [0, 0], sizes = [4, 32], strides = [1, 1]} : vector<4x128xf32> to vector<4x32xf32>
    %140 = vector.extract_strided_slice %138 {offsets = [0, 32], sizes = [4, 32], strides = [1, 1]} : vector<4x128xf32> to vector<4x32xf32>
    %141 = vector.extract_strided_slice %138 {offsets = [0, 64], sizes = [4, 32], strides = [1, 1]} : vector<4x128xf32> to vector<4x32xf32>
    %142 = vector.extract_strided_slice %138 {offsets = [0, 96], sizes = [4, 32], strides = [1, 1]} : vector<4x128xf32> to vector<4x32xf32>
    %143 = arith.mulf %140, %118 : vector<4x32xf32>
    %144 = arith.mulf %139, %141 : vector<4x32xf32>
    %145 = arith.addf %143, %144 : vector<4x32xf32>
    %146 = math.tanh %145 : vector<4x32xf32>
    %147 = arith.mulf %142, %146 : vector<4x32xf32>
    %c5_i32 = arith.constant 5 : i32
    %148 = vector.broadcast %c5_i32 : i32 to vector<4x1xi32>
    %149 = arith.cmpi eq, %0, %148 : vector<4x1xi32>
    %150 = vector.shape_cast %149 : vector<4x1xi1> to vector<4x1xi1>
    %151 = vector.broadcast %150 : vector<4x1xi1> to vector<4x32xi1>
    %152 = arith.select %151, %147, %125 : vector<4x32xi1>, vector<4x32xf32>
    %153 = vector.shape_cast %149 : vector<4x1xi1> to vector<4x1xi1>
    %154 = vector.broadcast %153 : vector<4x1xi1> to vector<4x32xi1>
    %155 = arith.select %154, %145, %128 : vector<4x32xi1>, vector<4x32xf32>
    %156 = vector.extract_strided_slice %6 {offsets = [20, 0], sizes = [4, 128], strides = [1, 1]} : vector<32x128xf32> to vector<4x128xf32>
    %cst_27 = arith.constant dense<0.000000e+00> : vector<4x128xf32>
    %157 = tpu.matmul %147, %20, %cst_27 {dimension_numbers = #tpu.dot_dimension_numbers<[1], [0], [0], [1], [0, 0, 1, 1], [], []>} : vector<4x32xf32>, vector<32x128xf32>, vector<4x128xf32> -> vector<4x128xf32>
    %158 = arith.addf %156, %157 : vector<4x128xf32>
    %159 = math.tanh %158 : vector<4x128xf32>
    %160 = arith.negf %158 : vector<4x128xf32>
    %161 = math.exp %160 : vector<4x128xf32>
    %cst_28 = arith.constant 1.000000e+00 : f32
    %162 = vector.broadcast %cst_28 : f32 to vector<4x128xf32>
    %163 = arith.addf %162, %161 : vector<4x128xf32>
    %164 = arith.divf %162, %163 : vector<4x128xf32>
    %165 = arith.select %18, %159, %164 : vector<4x128xi1>, vector<4x128xf32>
    %166 = vector.extract_strided_slice %165 {offsets = [0, 0], sizes = [4, 32], strides = [1, 1]} : vector<4x128xf32> to vector<4x32xf32>
    %167 = vector.extract_strided_slice %165 {offsets = [0, 32], sizes = [4, 32], strides = [1, 1]} : vector<4x128xf32> to vector<4x32xf32>
    %168 = vector.extract_strided_slice %165 {offsets = [0, 64], sizes = [4, 32], strides = [1, 1]} : vector<4x128xf32> to vector<4x32xf32>
    %169 = vector.extract_strided_slice %165 {offsets = [0, 96], sizes = [4, 32], strides = [1, 1]} : vector<4x128xf32> to vector<4x32xf32>
    %170 = arith.mulf %167, %145 : vector<4x32xf32>
    %171 = arith.mulf %166, %168 : vector<4x32xf32>
    %172 = arith.addf %170, %171 : vector<4x32xf32>
    %173 = math.tanh %172 : vector<4x32xf32>
    %174 = arith.mulf %169, %173 : vector<4x32xf32>
    %c6_i32 = arith.constant 6 : i32
    %175 = vector.broadcast %c6_i32 : i32 to vector<4x1xi32>
    %176 = arith.cmpi eq, %0, %175 : vector<4x1xi32>
    %177 = vector.shape_cast %176 : vector<4x1xi1> to vector<4x1xi1>
    %178 = vector.broadcast %177 : vector<4x1xi1> to vector<4x32xi1>
    %179 = arith.select %178, %174, %152 : vector<4x32xi1>, vector<4x32xf32>
    %180 = vector.shape_cast %176 : vector<4x1xi1> to vector<4x1xi1>
    %181 = vector.broadcast %180 : vector<4x1xi1> to vector<4x32xi1>
    %182 = arith.select %181, %172, %155 : vector<4x32xi1>, vector<4x32xf32>
    %183 = vector.extract_strided_slice %6 {offsets = [24, 0], sizes = [4, 128], strides = [1, 1]} : vector<32x128xf32> to vector<4x128xf32>
    %cst_29 = arith.constant dense<0.000000e+00> : vector<4x128xf32>
    %184 = tpu.matmul %174, %20, %cst_29 {dimension_numbers = #tpu.dot_dimension_numbers<[1], [0], [0], [1], [0, 0, 1, 1], [], []>} : vector<4x32xf32>, vector<32x128xf32>, vector<4x128xf32> -> vector<4x128xf32>
    %185 = arith.addf %183, %184 : vector<4x128xf32>
    %186 = math.tanh %185 : vector<4x128xf32>
    %187 = arith.negf %185 : vector<4x128xf32>
    %188 = math.exp %187 : vector<4x128xf32>
    %cst_30 = arith.constant 1.000000e+00 : f32
    %189 = vector.broadcast %cst_30 : f32 to vector<4x128xf32>
    %190 = arith.addf %189, %188 : vector<4x128xf32>
    %191 = arith.divf %189, %190 : vector<4x128xf32>
    %192 = arith.select %18, %186, %191 : vector<4x128xi1>, vector<4x128xf32>
    %193 = vector.extract_strided_slice %192 {offsets = [0, 0], sizes = [4, 32], strides = [1, 1]} : vector<4x128xf32> to vector<4x32xf32>
    %194 = vector.extract_strided_slice %192 {offsets = [0, 32], sizes = [4, 32], strides = [1, 1]} : vector<4x128xf32> to vector<4x32xf32>
    %195 = vector.extract_strided_slice %192 {offsets = [0, 64], sizes = [4, 32], strides = [1, 1]} : vector<4x128xf32> to vector<4x32xf32>
    %196 = vector.extract_strided_slice %192 {offsets = [0, 96], sizes = [4, 32], strides = [1, 1]} : vector<4x128xf32> to vector<4x32xf32>
    %197 = arith.mulf %194, %172 : vector<4x32xf32>
    %198 = arith.mulf %193, %195 : vector<4x32xf32>
    %199 = arith.addf %197, %198 : vector<4x32xf32>
    %200 = math.tanh %199 : vector<4x32xf32>
    %201 = arith.mulf %196, %200 : vector<4x32xf32>
    %c7_i32 = arith.constant 7 : i32
    %202 = vector.broadcast %c7_i32 : i32 to vector<4x1xi32>
    %203 = arith.cmpi eq, %0, %202 : vector<4x1xi32>
    %204 = vector.shape_cast %203 : vector<4x1xi1> to vector<4x1xi1>
    %205 = vector.broadcast %204 : vector<4x1xi1> to vector<4x32xi1>
    %206 = arith.select %205, %201, %179 : vector<4x32xi1>, vector<4x32xf32>
    %207 = vector.shape_cast %203 : vector<4x1xi1> to vector<4x1xi1>
    %208 = vector.broadcast %207 : vector<4x1xi1> to vector<4x32xi1>
    %209 = arith.select %208, %199, %182 : vector<4x32xi1>, vector<4x32xf32>
    %210 = vector.extract_strided_slice %6 {offsets = [28, 0], sizes = [4, 128], strides = [1, 1]} : vector<32x128xf32> to vector<4x128xf32>
    %cst_31 = arith.constant dense<0.000000e+00> : vector<4x128xf32>
    %211 = tpu.matmul %201, %20, %cst_31 {dimension_numbers = #tpu.dot_dimension_numbers<[1], [0], [0], [1], [0, 0, 1, 1], [], []>} : vector<4x32xf32>, vector<32x128xf32>, vector<4x128xf32> -> vector<4x128xf32>
    %212 = arith.addf %210, %211 : vector<4x128xf32>
    %213 = math.tanh %212 : vector<4x128xf32>
    %214 = arith.negf %212 : vector<4x128xf32>
    %215 = math.exp %214 : vector<4x128xf32>
    %cst_32 = arith.constant 1.000000e+00 : f32
    %216 = vector.broadcast %cst_32 : f32 to vector<4x128xf32>
    %217 = arith.addf %216, %215 : vector<4x128xf32>
    %218 = arith.divf %216, %217 : vector<4x128xf32>
    %219 = arith.select %18, %213, %218 : vector<4x128xi1>, vector<4x128xf32>
    %220 = vector.extract_strided_slice %219 {offsets = [0, 0], sizes = [4, 32], strides = [1, 1]} : vector<4x128xf32> to vector<4x32xf32>
    %221 = vector.extract_strided_slice %219 {offsets = [0, 32], sizes = [4, 32], strides = [1, 1]} : vector<4x128xf32> to vector<4x32xf32>
    %222 = vector.extract_strided_slice %219 {offsets = [0, 64], sizes = [4, 32], strides = [1, 1]} : vector<4x128xf32> to vector<4x32xf32>
    %223 = vector.extract_strided_slice %219 {offsets = [0, 96], sizes = [4, 32], strides = [1, 1]} : vector<4x128xf32> to vector<4x32xf32>
    %224 = arith.mulf %221, %199 : vector<4x32xf32>
    %225 = arith.mulf %220, %222 : vector<4x32xf32>
    %226 = arith.addf %224, %225 : vector<4x32xf32>
    %227 = math.tanh %226 : vector<4x32xf32>
    %228 = arith.mulf %223, %227 : vector<4x32xf32>
    %c8_i32 = arith.constant 8 : i32
    %229 = vector.broadcast %c8_i32 : i32 to vector<4x1xi32>
    %230 = arith.cmpi eq, %0, %229 : vector<4x1xi32>
    %231 = vector.shape_cast %230 : vector<4x1xi1> to vector<4x1xi1>
    %232 = vector.broadcast %231 : vector<4x1xi1> to vector<4x32xi1>
    %233 = arith.select %232, %228, %206 : vector<4x32xi1>, vector<4x32xf32>
    %234 = vector.shape_cast %230 : vector<4x1xi1> to vector<4x1xi1>
    %235 = vector.broadcast %234 : vector<4x1xi1> to vector<4x32xi1>
    %236 = arith.select %235, %226, %209 : vector<4x32xi1>, vector<4x32xf32>
    %c0_33 = arith.constant 0 : index
    %c0_34 = arith.constant 0 : index
    %237 = vector.load %arg7[%c0_33, %c0_34] : memref<32x128xf32, #tpu.memory_space<vmem>>, vector<32x128xf32>
    %238 = vector.extract_strided_slice %12 {offsets = [0, 0], sizes = [4, 128], strides = [1, 1]} : vector<32x128xf32> to vector<4x128xf32>
    %cst_35 = arith.constant dense<0.000000e+00> : vector<4x128xf32>
    %239 = tpu.matmul %233, %237, %cst_35 {dimension_numbers = #tpu.dot_dimension_numbers<[1], [0], [0], [1], [0, 0, 1, 1], [], []>} : vector<4x32xf32>, vector<32x128xf32>, vector<4x128xf32> -> vector<4x128xf32>
    %240 = arith.addf %238, %239 : vector<4x128xf32>
    %241 = math.tanh %240 : vector<4x128xf32>
    %242 = arith.negf %240 : vector<4x128xf32>
    %243 = math.exp %242 : vector<4x128xf32>
    %cst_36 = arith.constant 1.000000e+00 : f32
    %244 = vector.broadcast %cst_36 : f32 to vector<4x128xf32>
    %245 = arith.addf %244, %243 : vector<4x128xf32>
    %246 = arith.divf %244, %245 : vector<4x128xf32>
    %247 = arith.select %18, %241, %246 : vector<4x128xi1>, vector<4x128xf32>
    %248 = vector.extract_strided_slice %247 {offsets = [0, 0], sizes = [4, 32], strides = [1, 1]} : vector<4x128xf32> to vector<4x32xf32>
    %249 = vector.extract_strided_slice %247 {offsets = [0, 32], sizes = [4, 32], strides = [1, 1]} : vector<4x128xf32> to vector<4x32xf32>
    %250 = vector.extract_strided_slice %247 {offsets = [0, 64], sizes = [4, 32], strides = [1, 1]} : vector<4x128xf32> to vector<4x32xf32>
    %251 = vector.extract_strided_slice %247 {offsets = [0, 96], sizes = [4, 32], strides = [1, 1]} : vector<4x128xf32> to vector<4x32xf32>
    %252 = arith.mulf %249, %236 : vector<4x32xf32>
    %253 = arith.mulf %248, %250 : vector<4x32xf32>
    %254 = arith.addf %252, %253 : vector<4x32xf32>
    %255 = math.tanh %254 : vector<4x32xf32>
    %256 = arith.mulf %251, %255 : vector<4x32xf32>
    %257 = vector.extract_strided_slice %12 {offsets = [4, 0], sizes = [4, 128], strides = [1, 1]} : vector<32x128xf32> to vector<4x128xf32>
    %cst_37 = arith.constant dense<0.000000e+00> : vector<4x128xf32>
    %258 = tpu.matmul %256, %237, %cst_37 {dimension_numbers = #tpu.dot_dimension_numbers<[1], [0], [0], [1], [0, 0, 1, 1], [], []>} : vector<4x32xf32>, vector<32x128xf32>, vector<4x128xf32> -> vector<4x128xf32>
    %259 = arith.addf %257, %258 : vector<4x128xf32>
    %260 = math.tanh %259 : vector<4x128xf32>
    %261 = arith.negf %259 : vector<4x128xf32>
    %262 = math.exp %261 : vector<4x128xf32>
    %cst_38 = arith.constant 1.000000e+00 : f32
    %263 = vector.broadcast %cst_38 : f32 to vector<4x128xf32>
    %264 = arith.addf %263, %262 : vector<4x128xf32>
    %265 = arith.divf %263, %264 : vector<4x128xf32>
    %266 = arith.select %18, %260, %265 : vector<4x128xi1>, vector<4x128xf32>
    %267 = vector.extract_strided_slice %266 {offsets = [0, 0], sizes = [4, 32], strides = [1, 1]} : vector<4x128xf32> to vector<4x32xf32>
    %268 = vector.extract_strided_slice %266 {offsets = [0, 32], sizes = [4, 32], strides = [1, 1]} : vector<4x128xf32> to vector<4x32xf32>
    %269 = vector.extract_strided_slice %266 {offsets = [0, 64], sizes = [4, 32], strides = [1, 1]} : vector<4x128xf32> to vector<4x32xf32>
    %270 = vector.extract_strided_slice %266 {offsets = [0, 96], sizes = [4, 32], strides = [1, 1]} : vector<4x128xf32> to vector<4x32xf32>
    %271 = arith.mulf %268, %254 : vector<4x32xf32>
    %272 = arith.mulf %267, %269 : vector<4x32xf32>
    %273 = arith.addf %271, %272 : vector<4x32xf32>
    %274 = math.tanh %273 : vector<4x32xf32>
    %275 = arith.mulf %270, %274 : vector<4x32xf32>
    %276 = vector.extract_strided_slice %12 {offsets = [8, 0], sizes = [4, 128], strides = [1, 1]} : vector<32x128xf32> to vector<4x128xf32>
    %cst_39 = arith.constant dense<0.000000e+00> : vector<4x128xf32>
    %277 = tpu.matmul %275, %237, %cst_39 {dimension_numbers = #tpu.dot_dimension_numbers<[1], [0], [0], [1], [0, 0, 1, 1], [], []>} : vector<4x32xf32>, vector<32x128xf32>, vector<4x128xf32> -> vector<4x128xf32>
    %278 = arith.addf %276, %277 : vector<4x128xf32>
    %279 = math.tanh %278 : vector<4x128xf32>
    %280 = arith.negf %278 : vector<4x128xf32>
    %281 = math.exp %280 : vector<4x128xf32>
    %cst_40 = arith.constant 1.000000e+00 : f32
    %282 = vector.broadcast %cst_40 : f32 to vector<4x128xf32>
    %283 = arith.addf %282, %281 : vector<4x128xf32>
    %284 = arith.divf %282, %283 : vector<4x128xf32>
    %285 = arith.select %18, %279, %284 : vector<4x128xi1>, vector<4x128xf32>
    %286 = vector.extract_strided_slice %285 {offsets = [0, 0], sizes = [4, 32], strides = [1, 1]} : vector<4x128xf32> to vector<4x32xf32>
    %287 = vector.extract_strided_slice %285 {offsets = [0, 32], sizes = [4, 32], strides = [1, 1]} : vector<4x128xf32> to vector<4x32xf32>
    %288 = vector.extract_strided_slice %285 {offsets = [0, 64], sizes = [4, 32], strides = [1, 1]} : vector<4x128xf32> to vector<4x32xf32>
    %289 = vector.extract_strided_slice %285 {offsets = [0, 96], sizes = [4, 32], strides = [1, 1]} : vector<4x128xf32> to vector<4x32xf32>
    %290 = arith.mulf %287, %273 : vector<4x32xf32>
    %291 = arith.mulf %286, %288 : vector<4x32xf32>
    %292 = arith.addf %290, %291 : vector<4x32xf32>
    %293 = math.tanh %292 : vector<4x32xf32>
    %294 = arith.mulf %289, %293 : vector<4x32xf32>
    %295 = vector.extract_strided_slice %12 {offsets = [12, 0], sizes = [4, 128], strides = [1, 1]} : vector<32x128xf32> to vector<4x128xf32>
    %cst_41 = arith.constant dense<0.000000e+00> : vector<4x128xf32>
    %296 = tpu.matmul %294, %237, %cst_41 {dimension_numbers = #tpu.dot_dimension_numbers<[1], [0], [0], [1], [0, 0, 1, 1], [], []>} : vector<4x32xf32>, vector<32x128xf32>, vector<4x128xf32> -> vector<4x128xf32>
    %297 = arith.addf %295, %296 : vector<4x128xf32>
    %298 = math.tanh %297 : vector<4x128xf32>
    %299 = arith.negf %297 : vector<4x128xf32>
    %300 = math.exp %299 : vector<4x128xf32>
    %cst_42 = arith.constant 1.000000e+00 : f32
    %301 = vector.broadcast %cst_42 : f32 to vector<4x128xf32>
    %302 = arith.addf %301, %300 : vector<4x128xf32>
    %303 = arith.divf %301, %302 : vector<4x128xf32>
    %304 = arith.select %18, %298, %303 : vector<4x128xi1>, vector<4x128xf32>
    %305 = vector.extract_strided_slice %304 {offsets = [0, 0], sizes = [4, 32], strides = [1, 1]} : vector<4x128xf32> to vector<4x32xf32>
    %306 = vector.extract_strided_slice %304 {offsets = [0, 32], sizes = [4, 32], strides = [1, 1]} : vector<4x128xf32> to vector<4x32xf32>
    %307 = vector.extract_strided_slice %304 {offsets = [0, 64], sizes = [4, 32], strides = [1, 1]} : vector<4x128xf32> to vector<4x32xf32>
    %308 = vector.extract_strided_slice %304 {offsets = [0, 96], sizes = [4, 32], strides = [1, 1]} : vector<4x128xf32> to vector<4x32xf32>
    %309 = arith.mulf %306, %292 : vector<4x32xf32>
    %310 = arith.mulf %305, %307 : vector<4x32xf32>
    %311 = arith.addf %309, %310 : vector<4x32xf32>
    %312 = math.tanh %311 : vector<4x32xf32>
    %313 = arith.mulf %308, %312 : vector<4x32xf32>
    %314 = vector.extract_strided_slice %12 {offsets = [16, 0], sizes = [4, 128], strides = [1, 1]} : vector<32x128xf32> to vector<4x128xf32>
    %cst_43 = arith.constant dense<0.000000e+00> : vector<4x128xf32>
    %315 = tpu.matmul %313, %237, %cst_43 {dimension_numbers = #tpu.dot_dimension_numbers<[1], [0], [0], [1], [0, 0, 1, 1], [], []>} : vector<4x32xf32>, vector<32x128xf32>, vector<4x128xf32> -> vector<4x128xf32>
    %316 = arith.addf %314, %315 : vector<4x128xf32>
    %317 = math.tanh %316 : vector<4x128xf32>
    %318 = arith.negf %316 : vector<4x128xf32>
    %319 = math.exp %318 : vector<4x128xf32>
    %cst_44 = arith.constant 1.000000e+00 : f32
    %320 = vector.broadcast %cst_44 : f32 to vector<4x128xf32>
    %321 = arith.addf %320, %319 : vector<4x128xf32>
    %322 = arith.divf %320, %321 : vector<4x128xf32>
    %323 = arith.select %18, %317, %322 : vector<4x128xi1>, vector<4x128xf32>
    %324 = vector.extract_strided_slice %323 {offsets = [0, 0], sizes = [4, 32], strides = [1, 1]} : vector<4x128xf32> to vector<4x32xf32>
    %325 = vector.extract_strided_slice %323 {offsets = [0, 32], sizes = [4, 32], strides = [1, 1]} : vector<4x128xf32> to vector<4x32xf32>
    %326 = vector.extract_strided_slice %323 {offsets = [0, 64], sizes = [4, 32], strides = [1, 1]} : vector<4x128xf32> to vector<4x32xf32>
    %327 = vector.extract_strided_slice %323 {offsets = [0, 96], sizes = [4, 32], strides = [1, 1]} : vector<4x128xf32> to vector<4x32xf32>
    %328 = arith.mulf %325, %311 : vector<4x32xf32>
    %329 = arith.mulf %324, %326 : vector<4x32xf32>
    %330 = arith.addf %328, %329 : vector<4x32xf32>
    %331 = math.tanh %330 : vector<4x32xf32>
    %332 = arith.mulf %327, %331 : vector<4x32xf32>
    %333 = vector.extract_strided_slice %12 {offsets = [20, 0], sizes = [4, 128], strides = [1, 1]} : vector<32x128xf32> to vector<4x128xf32>
    %cst_45 = arith.constant dense<0.000000e+00> : vector<4x128xf32>
    %334 = tpu.matmul %332, %237, %cst_45 {dimension_numbers = #tpu.dot_dimension_numbers<[1], [0], [0], [1], [0, 0, 1, 1], [], []>} : vector<4x32xf32>, vector<32x128xf32>, vector<4x128xf32> -> vector<4x128xf32>
    %335 = arith.addf %333, %334 : vector<4x128xf32>
    %336 = math.tanh %335 : vector<4x128xf32>
    %337 = arith.negf %335 : vector<4x128xf32>
    %338 = math.exp %337 : vector<4x128xf32>
    %cst_46 = arith.constant 1.000000e+00 : f32
    %339 = vector.broadcast %cst_46 : f32 to vector<4x128xf32>
    %340 = arith.addf %339, %338 : vector<4x128xf32>
    %341 = arith.divf %339, %340 : vector<4x128xf32>
    %342 = arith.select %18, %336, %341 : vector<4x128xi1>, vector<4x128xf32>
    %343 = vector.extract_strided_slice %342 {offsets = [0, 0], sizes = [4, 32], strides = [1, 1]} : vector<4x128xf32> to vector<4x32xf32>
    %344 = vector.extract_strided_slice %342 {offsets = [0, 32], sizes = [4, 32], strides = [1, 1]} : vector<4x128xf32> to vector<4x32xf32>
    %345 = vector.extract_strided_slice %342 {offsets = [0, 64], sizes = [4, 32], strides = [1, 1]} : vector<4x128xf32> to vector<4x32xf32>
    %346 = vector.extract_strided_slice %342 {offsets = [0, 96], sizes = [4, 32], strides = [1, 1]} : vector<4x128xf32> to vector<4x32xf32>
    %347 = arith.mulf %344, %330 : vector<4x32xf32>
    %348 = arith.mulf %343, %345 : vector<4x32xf32>
    %349 = arith.addf %347, %348 : vector<4x32xf32>
    %350 = math.tanh %349 : vector<4x32xf32>
    %351 = arith.mulf %346, %350 : vector<4x32xf32>
    %352 = vector.extract_strided_slice %12 {offsets = [24, 0], sizes = [4, 128], strides = [1, 1]} : vector<32x128xf32> to vector<4x128xf32>
    %cst_47 = arith.constant dense<0.000000e+00> : vector<4x128xf32>
    %353 = tpu.matmul %351, %237, %cst_47 {dimension_numbers = #tpu.dot_dimension_numbers<[1], [0], [0], [1], [0, 0, 1, 1], [], []>} : vector<4x32xf32>, vector<32x128xf32>, vector<4x128xf32> -> vector<4x128xf32>
    %354 = arith.addf %352, %353 : vector<4x128xf32>
    %355 = math.tanh %354 : vector<4x128xf32>
    %356 = arith.negf %354 : vector<4x128xf32>
    %357 = math.exp %356 : vector<4x128xf32>
    %cst_48 = arith.constant 1.000000e+00 : f32
    %358 = vector.broadcast %cst_48 : f32 to vector<4x128xf32>
    %359 = arith.addf %358, %357 : vector<4x128xf32>
    %360 = arith.divf %358, %359 : vector<4x128xf32>
    %361 = arith.select %18, %355, %360 : vector<4x128xi1>, vector<4x128xf32>
    %362 = vector.extract_strided_slice %361 {offsets = [0, 0], sizes = [4, 32], strides = [1, 1]} : vector<4x128xf32> to vector<4x32xf32>
    %363 = vector.extract_strided_slice %361 {offsets = [0, 32], sizes = [4, 32], strides = [1, 1]} : vector<4x128xf32> to vector<4x32xf32>
    %364 = vector.extract_strided_slice %361 {offsets = [0, 64], sizes = [4, 32], strides = [1, 1]} : vector<4x128xf32> to vector<4x32xf32>
    %365 = vector.extract_strided_slice %361 {offsets = [0, 96], sizes = [4, 32], strides = [1, 1]} : vector<4x128xf32> to vector<4x32xf32>
    %366 = arith.mulf %363, %349 : vector<4x32xf32>
    %367 = arith.mulf %362, %364 : vector<4x32xf32>
    %368 = arith.addf %366, %367 : vector<4x32xf32>
    %369 = math.tanh %368 : vector<4x32xf32>
    %370 = arith.mulf %365, %369 : vector<4x32xf32>
    %371 = vector.extract_strided_slice %12 {offsets = [28, 0], sizes = [4, 128], strides = [1, 1]} : vector<32x128xf32> to vector<4x128xf32>
    %cst_49 = arith.constant dense<0.000000e+00> : vector<4x128xf32>
    %372 = tpu.matmul %370, %237, %cst_49 {dimension_numbers = #tpu.dot_dimension_numbers<[1], [0], [0], [1], [0, 0, 1, 1], [], []>} : vector<4x32xf32>, vector<32x128xf32>, vector<4x128xf32> -> vector<4x128xf32>
    %373 = arith.addf %371, %372 : vector<4x128xf32>
    %374 = math.tanh %373 : vector<4x128xf32>
    %375 = arith.negf %373 : vector<4x128xf32>
    %376 = math.exp %375 : vector<4x128xf32>
    %cst_50 = arith.constant 1.000000e+00 : f32
    %377 = vector.broadcast %cst_50 : f32 to vector<4x128xf32>
    %378 = arith.addf %377, %376 : vector<4x128xf32>
    %379 = arith.divf %377, %378 : vector<4x128xf32>
    %380 = arith.select %18, %374, %379 : vector<4x128xi1>, vector<4x128xf32>
    %381 = vector.extract_strided_slice %380 {offsets = [0, 0], sizes = [4, 32], strides = [1, 1]} : vector<4x128xf32> to vector<4x32xf32>
    %382 = vector.extract_strided_slice %380 {offsets = [0, 32], sizes = [4, 32], strides = [1, 1]} : vector<4x128xf32> to vector<4x32xf32>
    %383 = vector.extract_strided_slice %380 {offsets = [0, 64], sizes = [4, 32], strides = [1, 1]} : vector<4x128xf32> to vector<4x32xf32>
    %384 = vector.extract_strided_slice %380 {offsets = [0, 96], sizes = [4, 32], strides = [1, 1]} : vector<4x128xf32> to vector<4x32xf32>
    %385 = arith.mulf %382, %368 : vector<4x32xf32>
    %386 = arith.mulf %381, %383 : vector<4x32xf32>
    %387 = arith.addf %385, %386 : vector<4x32xf32>
    %388 = math.tanh %387 : vector<4x32xf32>
    %389 = arith.mulf %384, %388 : vector<4x32xf32>
    %390 = vector.shape_cast %39 : vector<4x32xf32> to vector<1x4x32xf32>
    %391 = vector.shape_cast %66 : vector<4x32xf32> to vector<1x4x32xf32>
    %392 = vector.shape_cast %93 : vector<4x32xf32> to vector<1x4x32xf32>
    %393 = vector.shape_cast %120 : vector<4x32xf32> to vector<1x4x32xf32>
    %394 = vector.shape_cast %147 : vector<4x32xf32> to vector<1x4x32xf32>
    %395 = vector.shape_cast %174 : vector<4x32xf32> to vector<1x4x32xf32>
    %396 = vector.shape_cast %201 : vector<4x32xf32> to vector<1x4x32xf32>
    %397 = vector.shape_cast %228 : vector<4x32xf32> to vector<1x4x32xf32>
    %398 = tpu.concatenate %390, %391, %392, %393, %394, %395, %396, %397 in 0 : vector<1x4x32xf32>, vector<1x4x32xf32>, vector<1x4x32xf32>, vector<1x4x32xf32>, vector<1x4x32xf32>, vector<1x4x32xf32>, vector<1x4x32xf32>, vector<1x4x32xf32> -> vector<8x4x32xf32>
    %399 = vector.shape_cast %256 : vector<4x32xf32> to vector<1x4x32xf32>
    %400 = vector.shape_cast %275 : vector<4x32xf32> to vector<1x4x32xf32>
    %401 = vector.shape_cast %294 : vector<4x32xf32> to vector<1x4x32xf32>
    %402 = vector.shape_cast %313 : vector<4x32xf32> to vector<1x4x32xf32>
    %403 = vector.shape_cast %332 : vector<4x32xf32> to vector<1x4x32xf32>
    %404 = vector.shape_cast %351 : vector<4x32xf32> to vector<1x4x32xf32>
    %405 = vector.shape_cast %370 : vector<4x32xf32> to vector<1x4x32xf32>
    %406 = vector.shape_cast %389 : vector<4x32xf32> to vector<1x4x32xf32>
    %407 = tpu.concatenate %399, %400, %401, %402, %403, %404, %405, %406 in 0 : vector<1x4x32xf32>, vector<1x4x32xf32>, vector<1x4x32xf32>, vector<1x4x32xf32>, vector<1x4x32xf32>, vector<1x4x32xf32>, vector<1x4x32xf32>, vector<1x4x32xf32> -> vector<8x4x32xf32>
    %408 = tpu.iota {dimensions = array<i32: 1>} : vector<8x8xi32>
    %409 = vector.extract_strided_slice %407 {offsets = [0, 0, 0], sizes = [8, 1, 32], strides = [1, 1, 1]} : vector<8x4x32xf32> to vector<8x1x32xf32>
    %410 = vector.shape_cast %409 : vector<8x1x32xf32> to vector<8x32xf32>
    %411 = vector.extract_strided_slice %398 {offsets = [0, 0, 0], sizes = [8, 1, 32], strides = [1, 1, 1]} : vector<8x4x32xf32> to vector<8x1x32xf32>
    %412 = vector.shape_cast %411 : vector<8x1x32xf32> to vector<8x32xf32>
    %cst_51 = arith.constant dense<0.000000e+00> : vector<8x8xf32>
    %413 = tpu.matmul %410, %412, %cst_51 {dimension_numbers = #tpu.dot_dimension_numbers<[1], [1], [0], [0], [0, 0, 1, 0], [], []>} : vector<8x32xf32>, vector<8x32xf32>, vector<8x8xf32> -> vector<8x8xf32>
    %414 = vector.extract_strided_slice %0 {offsets = [0, 0], sizes = [1, 1], strides = [1, 1]} : vector<4x1xi32> to vector<1x1xi32>
    %415 = vector.broadcast %414 : vector<1x1xi32> to vector<8x8xi32>
    %416 = arith.cmpi slt, %408, %415 : vector<8x8xi32>
    %cst_52 = arith.constant -1.000000e+30 : f32
    %417 = vector.broadcast %cst_52 : f32 to vector<8x8xf32>
    %418 = arith.select %416, %413, %417 : vector<8x8xi1>, vector<8x8xf32>
    %cst_53 = arith.constant dense<0xFF800000> : vector<8xf32>
    %419 = vector.multi_reduction <maximumf>, %418, %cst_53 [1] : vector<8x8xf32> to vector<8xf32>
    %420 = vector.shape_cast %419 : vector<8xf32> to vector<8x1xf32>
    %421 = vector.broadcast %420 : vector<8x1xf32> to vector<8x8xf32>
    %422 = arith.subf %418, %421 : vector<8x8xf32>
    %423 = math.exp %422 : vector<8x8xf32>
    %cst_54 = arith.constant dense<0.000000e+00> : vector<8xf32>
    %424 = vector.multi_reduction <add>, %423, %cst_54 [1] : vector<8x8xf32> to vector<8xf32>
    %425 = vector.shape_cast %424 : vector<8xf32> to vector<8x1xf32>
    %426 = vector.broadcast %425 : vector<8x1xf32> to vector<8x8xf32>
    %427 = arith.divf %423, %426 : vector<8x8xf32>
    %c0_55 = arith.constant 0 : index
    %c0_56 = arith.constant 0 : index
    %c0_57 = arith.constant 0 : index
    %428 = vector.load %arg9[%c0_55, %c0_56, %c0_57] : memref<4x8x8xf32, #tpu.memory_space<vmem>>, vector<1x8x8xf32>
    %429 = vector.shape_cast %428 : vector<1x8x8xf32> to vector<8x8xf32>
    %430 = vector.shape_cast %427 : vector<8x8xf32> to vector<1x8x8xf32>
    tpu.vector_store %arg9[%c0_55, %c0_56, %c0_57], %430 {strides = array<i32>} : memref<4x8x8xf32, #tpu.memory_space<vmem>>, vector<1x8x8xf32>,
    %431 = vector.extract_strided_slice %407 {offsets = [0, 1, 0], sizes = [8, 1, 32], strides = [1, 1, 1]} : vector<8x4x32xf32> to vector<8x1x32xf32>
    %432 = vector.shape_cast %431 : vector<8x1x32xf32> to vector<8x32xf32>
    %433 = vector.extract_strided_slice %398 {offsets = [0, 1, 0], sizes = [8, 1, 32], strides = [1, 1, 1]} : vector<8x4x32xf32> to vector<8x1x32xf32>
    %434 = vector.shape_cast %433 : vector<8x1x32xf32> to vector<8x32xf32>
    %cst_58 = arith.constant dense<0.000000e+00> : vector<8x8xf32>
    %435 = tpu.matmul %432, %434, %cst_58 {dimension_numbers = #tpu.dot_dimension_numbers<[1], [1], [0], [0], [0, 0, 1, 0], [], []>} : vector<8x32xf32>, vector<8x32xf32>, vector<8x8xf32> -> vector<8x8xf32>
    %436 = vector.extract_strided_slice %0 {offsets = [1, 0], sizes = [1, 1], strides = [1, 1]} : vector<4x1xi32> to vector<1x1xi32>
    %437 = vector.broadcast %436 : vector<1x1xi32> to vector<8x8xi32>
    %438 = arith.cmpi slt, %408, %437 : vector<8x8xi32>
    %cst_59 = arith.constant -1.000000e+30 : f32
    %439 = vector.broadcast %cst_59 : f32 to vector<8x8xf32>
    %440 = arith.select %438, %435, %439 : vector<8x8xi1>, vector<8x8xf32>
    %cst_60 = arith.constant dense<0xFF800000> : vector<8xf32>
    %441 = vector.multi_reduction <maximumf>, %440, %cst_60 [1] : vector<8x8xf32> to vector<8xf32>
    %442 = vector.shape_cast %441 : vector<8xf32> to vector<8x1xf32>
    %443 = vector.broadcast %442 : vector<8x1xf32> to vector<8x8xf32>
    %444 = arith.subf %440, %443 : vector<8x8xf32>
    %445 = math.exp %444 : vector<8x8xf32>
    %cst_61 = arith.constant dense<0.000000e+00> : vector<8xf32>
    %446 = vector.multi_reduction <add>, %445, %cst_61 [1] : vector<8x8xf32> to vector<8xf32>
    %447 = vector.shape_cast %446 : vector<8xf32> to vector<8x1xf32>
    %448 = vector.broadcast %447 : vector<8x1xf32> to vector<8x8xf32>
    %449 = arith.divf %445, %448 : vector<8x8xf32>
    %c1 = arith.constant 1 : index
    %c0_62 = arith.constant 0 : index
    %c0_63 = arith.constant 0 : index
    %450 = vector.load %arg9[%c1, %c0_62, %c0_63] : memref<4x8x8xf32, #tpu.memory_space<vmem>>, vector<1x8x8xf32>
    %451 = vector.shape_cast %450 : vector<1x8x8xf32> to vector<8x8xf32>
    %452 = vector.shape_cast %449 : vector<8x8xf32> to vector<1x8x8xf32>
    tpu.vector_store %arg9[%c1, %c0_62, %c0_63], %452 {strides = array<i32>} : memref<4x8x8xf32, #tpu.memory_space<vmem>>, vector<1x8x8xf32>,
    %453 = vector.extract_strided_slice %407 {offsets = [0, 2, 0], sizes = [8, 1, 32], strides = [1, 1, 1]} : vector<8x4x32xf32> to vector<8x1x32xf32>
    %454 = vector.shape_cast %453 : vector<8x1x32xf32> to vector<8x32xf32>
    %455 = vector.extract_strided_slice %398 {offsets = [0, 2, 0], sizes = [8, 1, 32], strides = [1, 1, 1]} : vector<8x4x32xf32> to vector<8x1x32xf32>
    %456 = vector.shape_cast %455 : vector<8x1x32xf32> to vector<8x32xf32>
    %cst_64 = arith.constant dense<0.000000e+00> : vector<8x8xf32>
    %457 = tpu.matmul %454, %456, %cst_64 {dimension_numbers = #tpu.dot_dimension_numbers<[1], [1], [0], [0], [0, 0, 1, 0], [], []>} : vector<8x32xf32>, vector<8x32xf32>, vector<8x8xf32> -> vector<8x8xf32>
    %458 = vector.extract_strided_slice %0 {offsets = [2, 0], sizes = [1, 1], strides = [1, 1]} : vector<4x1xi32> to vector<1x1xi32>
    %459 = vector.broadcast %458 : vector<1x1xi32> to vector<8x8xi32>
    %460 = arith.cmpi slt, %408, %459 : vector<8x8xi32>
    %cst_65 = arith.constant -1.000000e+30 : f32
    %461 = vector.broadcast %cst_65 : f32 to vector<8x8xf32>
    %462 = arith.select %460, %457, %461 : vector<8x8xi1>, vector<8x8xf32>
    %cst_66 = arith.constant dense<0xFF800000> : vector<8xf32>
    %463 = vector.multi_reduction <maximumf>, %462, %cst_66 [1] : vector<8x8xf32> to vector<8xf32>
    %464 = vector.shape_cast %463 : vector<8xf32> to vector<8x1xf32>
    %465 = vector.broadcast %464 : vector<8x1xf32> to vector<8x8xf32>
    %466 = arith.subf %462, %465 : vector<8x8xf32>
    %467 = math.exp %466 : vector<8x8xf32>
    %cst_67 = arith.constant dense<0.000000e+00> : vector<8xf32>
    %468 = vector.multi_reduction <add>, %467, %cst_67 [1] : vector<8x8xf32> to vector<8xf32>
    %469 = vector.shape_cast %468 : vector<8xf32> to vector<8x1xf32>
    %470 = vector.broadcast %469 : vector<8x1xf32> to vector<8x8xf32>
    %471 = arith.divf %467, %470 : vector<8x8xf32>
    %c2 = arith.constant 2 : index
    %c0_68 = arith.constant 0 : index
    %c0_69 = arith.constant 0 : index
    %472 = vector.load %arg9[%c2, %c0_68, %c0_69] : memref<4x8x8xf32, #tpu.memory_space<vmem>>, vector<1x8x8xf32>
    %473 = vector.shape_cast %472 : vector<1x8x8xf32> to vector<8x8xf32>
    %474 = vector.shape_cast %471 : vector<8x8xf32> to vector<1x8x8xf32>
    tpu.vector_store %arg9[%c2, %c0_68, %c0_69], %474 {strides = array<i32>} : memref<4x8x8xf32, #tpu.memory_space<vmem>>, vector<1x8x8xf32>,
    %475 = vector.extract_strided_slice %407 {offsets = [0, 3, 0], sizes = [8, 1, 32], strides = [1, 1, 1]} : vector<8x4x32xf32> to vector<8x1x32xf32>
    %476 = vector.shape_cast %475 : vector<8x1x32xf32> to vector<8x32xf32>
    %477 = vector.extract_strided_slice %398 {offsets = [0, 3, 0], sizes = [8, 1, 32], strides = [1, 1, 1]} : vector<8x4x32xf32> to vector<8x1x32xf32>
    %478 = vector.shape_cast %477 : vector<8x1x32xf32> to vector<8x32xf32>
    %cst_70 = arith.constant dense<0.000000e+00> : vector<8x8xf32>
    %479 = tpu.matmul %476, %478, %cst_70 {dimension_numbers = #tpu.dot_dimension_numbers<[1], [1], [0], [0], [0, 0, 1, 0], [], []>} : vector<8x32xf32>, vector<8x32xf32>, vector<8x8xf32> -> vector<8x8xf32>
    %480 = vector.extract_strided_slice %0 {offsets = [3, 0], sizes = [1, 1], strides = [1, 1]} : vector<4x1xi32> to vector<1x1xi32>
    %481 = vector.broadcast %480 : vector<1x1xi32> to vector<8x8xi32>
    %482 = arith.cmpi slt, %408, %481 : vector<8x8xi32>
    %cst_71 = arith.constant -1.000000e+30 : f32
    %483 = vector.broadcast %cst_71 : f32 to vector<8x8xf32>
    %484 = arith.select %482, %479, %483 : vector<8x8xi1>, vector<8x8xf32>
    %cst_72 = arith.constant dense<0xFF800000> : vector<8xf32>
    %485 = vector.multi_reduction <maximumf>, %484, %cst_72 [1] : vector<8x8xf32> to vector<8xf32>
    %486 = vector.shape_cast %485 : vector<8xf32> to vector<8x1xf32>
    %487 = vector.broadcast %486 : vector<8x1xf32> to vector<8x8xf32>
    %488 = arith.subf %484, %487 : vector<8x8xf32>
    %489 = math.exp %488 : vector<8x8xf32>
    %cst_73 = arith.constant dense<0.000000e+00> : vector<8xf32>
    %490 = vector.multi_reduction <add>, %489, %cst_73 [1] : vector<8x8xf32> to vector<8xf32>
    %491 = vector.shape_cast %490 : vector<8xf32> to vector<8x1xf32>
    %492 = vector.broadcast %491 : vector<8x1xf32> to vector<8x8xf32>
    %493 = arith.divf %489, %492 : vector<8x8xf32>
    %c3 = arith.constant 3 : index
    %c0_74 = arith.constant 0 : index
    %c0_75 = arith.constant 0 : index
    %494 = vector.load %arg9[%c3, %c0_74, %c0_75] : memref<4x8x8xf32, #tpu.memory_space<vmem>>, vector<1x8x8xf32>
    %495 = vector.shape_cast %494 : vector<1x8x8xf32> to vector<8x8xf32>
    %496 = vector.shape_cast %493 : vector<8x8xf32> to vector<1x8x8xf32>
    tpu.vector_store %arg9[%c3, %c0_74, %c0_75], %496 {strides = array<i32>} : memref<4x8x8xf32, #tpu.memory_space<vmem>>, vector<1x8x8xf32>,
    return
  }
}

</mosaic_0001>

<bundles_post_ra>
// kernel: pointer_net_forward.1
= control target key start
LH: loop header
LB: loop body
LE: loop exit
PB: predicated region body
PF: predicated region fallthrough
CT: control target
= control target key end

     0   :  { %vm4008_vm0 = vcmask 64512   ;;  %v3259_v9 = vmov 0.0|0.0   ;;  %s3998_s0 = inlined_call_operand.vmem [shape: s32[4,1], index: 0, kind: input, shape index: {}]   ;;  %s3999_s1 = inlined_call_operand.vmem [shape: f32[32,8], index: 1, kind: input, shape index: {}]   ;;  %s4000_s2 = inlined_call_operand.vmem [shape: f32[32,8], index: 2, kind: input, shape index: {}]   ;;  %s4001_s3 = inlined_call_operand.vmem [shape: f32[8,128], index: 3, kind: input, shape index: {}]   ;;  %s4002_s4 = inlined_call_operand.vmem [shape: f32[32,128], index: 4, kind: input, shape index: {}]   ;;  %s4003_s5 = inlined_call_operand.vmem [shape: f32[1,128], index: 5, kind: input, shape index: {}]   ;;  %s4004_s6 = inlined_call_operand.vmem [shape: f32[8,128], index: 6, kind: input, shape index: {}]   ;;  %s4005_s7 = inlined_call_operand.vmem [shape: f32[32,128], index: 7, kind: input, shape index: {}]   ;;  %s4006_s8 = inlined_call_operand.vmem [shape: f32[1,128], index: 8, kind: input, shape index: {}]   ;;  %s4007_s9 = inlined_call_operand.hbm [shape: f32[4,8,8], index: 9, kind: output, shape index: {}]  }
   0x1   :  { %v38_v0 = vld [vmem:[%s4001_s3] sm:$0xff]  ;;  %v35_v2 = vld [vmem:[%s3999_s1 + $0x8] sm:$0xff]  ;;  %v36_v5 = vld [vmem:[%s3999_s1 + $0x10] sm:$0xff] }
   0x2   :  { %v34_v1 = vld [vmem:[%s3999_s1] sm:$0xff]  ;;  %2763 = vmatprep.subr.mxu0 %v38_v0  ;;  %v259_v4 = vld [vmem:[%s4002_s4 + $0x8] sm:$0xff]  ;;  %v260_v7 = vld [vmem:[%s4002_s4 + $0x10] sm:$0xff] }
   0x3   :  { %2765 = vmatprep.mubr.msk.f32.mxu0 %vm4008_vm0, %v34_v1  ;;  %v258_v3 = vld [vmem:[%s4002_s4] sm:$0xff]  ;;  %2764 = vmatpush3.msra.mxu0 %v38_v0  ;;  %v261_v8 = vld [vmem:[%s4002_s4 + $0x18] sm:$0xff] }
   0x4   :  { %v3338_v6 = vpack.c.bf16 %v259_v4, %v258_v3  ;;  %2766 = vmatmul.mubr.msk.f32.vlgmr.msra.gmra.mrb[0].mxu0 %vm4008_vm0, %v35_v2  ;;  %2975 = vmatprep.subr.bf16.mxu0 %v3259_v9 }
   0x5   :  { %14 = vsyncpa [#allocation3], 0  ;;  %2768 = vmatprep.mubr.msk.f32.mxu0 %vm4008_vm0, %v36_v5  ;;  %v37_v10 = vld [vmem:[%s3999_s1 + $0x18] sm:$0xff]  ;;  %v3353_v11 = vpack.c.bf16 %v261_v8, %v260_v7  ;;  %vm3260_vm1 = vmmov 0   ;;  %v3261_v12 = vmov 0.0   ;;  %v253_v27 = vlaneseq  ;;  %s3263_s26 = smov 32  }
   0x6   :  { %2977 = vmatpush3.bf16.msra.mxu0 %v3338_v6  ;;  %v2616_v13 = vld [vmem:[%s4003_s5] ss:$0 sm:$0xff]  ;;  %s3262_s5 = smov 64   ;;  %v145_v41 = vld [vmem:[%s4000_s2 + $0x8] sm:$0xff]  ;;  %v146_v42 = vld [vmem:[%s4000_s2 + $0x10] sm:$0xff]  ;;  %vm262_vm5 = vcmask 261120  }
   0x7   :  { %2978 = vmatprep.subr.bf16.mxu0 %v3259_v9  ;;  %v3380_v29 = vand.u32 127, %v253_v27  ;;  %v148_v39 = vld [vmem:[%s4004_s6] sm:$0xff]  ;;  %v147_v43 = vld [vmem:[%s4000_s2 + $0x18] sm:$0xff]  ;;  %vm2100_vm6 = vcmask 1041409   ;;  %vm2106_vm7 = vcmask 1043459   ;;  %vm2103_vm8 = vcmask 1042434  }
   0x8   :  { %2769 = vmatmul.mubr.msk.f32.gmra.mrb[2].mxu0 %vm4008_vm0, %v37_v10  ;;  %v144_v40 = vld [vmem:[%s4000_s2] sm:$0xff]  ;;  %2771 = vmatprep.subr.mxu1 %v148_v39  ;;  %vm2109_vm9 = vcmask 1044484   ;;  %vm4009_vm10 = vcmask 1045509   ;;  %s3266_s4 = smov [#allocation2]  }
   0x9   :  { %2787 = vmatprep.mubr.msk.f32.mxu0 %vm3260_vm1, %v3261_v12  ;;  %vm255_vm2 = vcmp.ge.s32.totalorder %v3380_v29, 64  ;;  %vm256_vm3 = vcmp.lt.s32.totalorder %v3380_v29, 96  ;;  %2773 = vmatprep.mubr.msk.f32.mxu1 %vm4008_vm0, %v144_v40  ;;  %v3429_v47 = vld [vmem:[%s4006_s8] ss:$0 sm:$0xff] }
   0xa   :  { %2980 = vmatpush3.bf16.msra.mxu0 %v3353_v11  ;;  %vm3384_vm4 = vmand %vm255_vm2, %vm256_vm3  ;;  %2772 = vmatpush3.msra.mxu1 %v148_v39 }
   0xb   :  { %2987 = vmatprep.subr.bf16.mxu0 %v3259_v9  ;;  %2774 = vmatmul.mubr.msk.f32.vlgmr.msra.gmra.mrb[0].mxu1 %vm4008_vm0, %v145_v41 }
   0xc   :  { %2981 = vmatprep.subr.bf16.mxu1 %v3259_v9  ;;  %2776 = vmatprep.mubr.msk.f32.mxu1 %vm4008_vm0, %v146_v42 }
   0xd   :  { %2788 = vmatmul.mubr.f32.vlgmr.msra.gmra.mrb[4].mxu0 %v3261_v12  ;;  %2983 = vmatpush3.bf16.msra.mxu1 %v3338_v6 }
   0xe   :  { %2989 = vmatpush3.bf16.msra.mxu0 %v3338_v6  ;;  %2809 = vmatprep.mubr.msk.f32.mxu0 %vm3260_vm1, %v3261_v12 }
   0xf   :  { %2990 = vmatprep.subr.bf16.mxu0 %v3259_v9  ;;  %2984 = vmatprep.subr.bf16.mxu1 %v3259_v9 }
  0x10   :  { %2777 = vmatmul.mubr.msk.f32.gmra.mrb[2].mxu1 %vm4008_vm0, %v147_v43  ;;  %vm2118_vm0 = vcmask 1047559  }
  0x11   :  { %2986 = vmatpush3.bf16.msra.mxu1 %v3353_v11  ;;  %2798 = vmatprep.mubr.msk.f32.mxu1 %vm3260_vm1, %v3261_v12 }
  0x12   :  { %2992 = vmatpush3.bf16.msra.mxu0 %v3353_v11  ;;  %2993 = vmatprep.subr.bf16.mxu1 %v3259_v9 }
  0x13   :  { %2999 = vmatprep.subr.bf16.mxu0 %v3259_v9 }
  0xd7   :  { %v2767_v14 = vpop.f32.mrb[0].mxu0 }
  0xd8   :  { %v3371_v15 = vadd.f32 %v2767_v14, %v2616_v13  ;;  %v125_v16 = vpop.f32.mrb[1].mxu0 }
  0xd9   :  { %v3377_v21 = vadd.f32 %v2616_v13, %v125_v16 }
  0xdb   :  { %v2770_v17 = vpop.f32.mrb[2].mxu0 }
  0xdc   :  { %v3373_v18 = vadd.f32 %v2770_v17, %v2616_v13  ;;  %v135_v19 = vpop.f32.mrb[3].mxu0 }
  0xdd   :  { %v3375_v20 = vadd.f32 %v2616_v13, %v135_v19 }
  0xde   :  { %v2775_v48 = vpop.f32.mrb[0].mxu1 }
  0xdf   :  { %v3432_v49 = vadd.f32 %v2775_v48, %v3429_v47  ;;  %v3434_v50 = vpop.f32.mrb[1].mxu1 }
  0xe0   :  { %v332_v22 = vpop.f32.mrb[4].mxu0 }
  0xe1   :  { %v336_v23 = vadd.f32 %v332_v22, %v3377_v21  ;;  %v2789_v24 = vpop.f32.mrb[5].mxu0 }
  0xe3   :  { %v2626_v25 = vmul.f32 -1.442695, %v336_v23  ;;  %v2778_v51 = vpop.f32.mrb[2].mxu1 }
  0xe4   :  { %v3437_v52 = vadd.f32 %v2778_v51, %v3429_v47  ;;  %v244_v53 = vpop.f32.mrb[3].mxu1 }
  0xe5   :  { %3091 = vpow2.f32 %v2626_v25  ;;  %v3440_v54 = vadd.f32 %v3429_v47, %v244_v53 }
  0xe6   :  { %3093 = vtanh.f32 %v336_v23 }
  0xef   :  { %v3092_v26 = vpop.eup %3091 }
  0xf0   :  { %v341_v28 = vadd.f32 1.0, %v3092_v26  ;;  %v3094_v31 = vpop.eup %3093 }
  0xf2   :  { %3095 = vrcp.f32 %v341_v28 }
  0xfc   :  { %v3096_v32 = vpop.eup %3095 }
  0xfd   :  { %v344_v33 = vsel %vm3384_vm4, %v3094_v31, %v3096_v32 }
  0xfe   :  { %347 = vrot.lane.b32.xlu0 %v344_v33, %s3262_s5  ;;  %v345_v36 = vmul.f32 0.0, %v344_v33 }
 0x170   :  { %v348_v34 = vpop.permute.xlu0 %347 }
 0x171   :  { %v350_v35 = vmul.f32 %v348_v34, %v344_v33 }
 0x173   :  { %352 = vrot.lane.b32.xlu0 %v350_v35, %s3263_s26 }
 0x1e5   :  { %v353_v37 = vpop.permute.xlu0 %352 }
 0x1e6   :  { %v3392_v38 = vadd.f32 %v353_v37, %v345_v36 }
 0x1e8   :  { %3097 = vtanh.f32 %v3392_v38  ;;  %v458_v4 = vrot.slane %v3392_v38, 4 }
 0x1f2   :  { %v3098_v44 = vpop.eup %3097 }
 0x1f3   :  { %358 = vrot.lane.b32.xlu1 %v3098_v44, %s3262_s5 }
 0x265   :  { %v359_v45 = vpop.permute.xlu1 %358 }
 0x266   :  { %v3422_v46 = vmul.f32 %v359_v45, %v344_v33 }
 0x268   :  { %371 = vrot.lane.b32.xlu1 %v3422_v46, %s3263_s26 }
 0x2da   :  { %v372_v55 = vpop.permute.xlu1 %371 }
 0x2db   :  { %2799 = vmatmul.mubr.msk.f32.vlgmr.msra.gmra.mrb[4].mxu1 %vm262_vm5, %v372_v55 }
 0x2dc   :  { %2995 = vmatpush3.bf16.msra.mxu1 %v3338_v6  ;;  %2820 = vmatprep.mubr.msk.f32.mxu1 %vm3260_vm1, %v3261_v12 }
 0x2dd   :  { %2996 = vmatprep.subr.bf16.mxu1 %v3259_v9 }
 0x2e0   :  { %2998 = vmatpush3.bf16.msra.mxu1 %v3353_v11 }
 0x2e1   :  { %3005 = vmatprep.subr.bf16.mxu1 %v3259_v9 }
 0x3ae   :  { %v441_v56 = vpop.f32.mrb[4].mxu1 }
 0x3af   :  { %v446_v57 = vrot.slane %v441_v56, 4  ;;  %v2800_v58 = vpop.f32.mrb[5].mxu1 }
 0x3b1   :  { %v448_v59 = vadd.f32 %v446_v57, %v3377_v21 }
 0x3b3   :  { %v2628_v60 = vmul.f32 -1.442695, %v448_v59 }
 0x3b5   :  { %3099 = vpow2.f32 %v2628_v60 }
 0x3b6   :  { %3101 = vtanh.f32 %v448_v59 }
 0x3bf   :  { %v3100_v61 = vpop.eup %3099 }
 0x3c0   :  { %v453_v62 = vadd.f32 1.0, %v3100_v61  ;;  %v3102_v63 = vpop.eup %3101 }
 0x3c2   :  { %3103 = vrcp.f32 %v453_v62 }
 0x3cc   :  { %v3104_v0 = vpop.eup %3103 }
 0x3cd   :  { %v456_v1 = vsel %vm3384_vm4, %v3102_v63, %v3104_v0 }
 0x3ce   :  { %462 = vrot.lane.b32.xlu0 %v456_v1, %s3262_s5  ;;  %v460_v5 = vmul.f32 %v458_v4, %v456_v1 }
 0x440   :  { %v463_v2 = vpop.permute.xlu0 %462 }
 0x441   :  { %v465_v3 = vmul.f32 %v463_v2, %v456_v1 }
 0x443   :  { %467 = vrot.lane.b32.xlu1 %v465_v3, %s3263_s26 }
 0x4b5   :  { %v468_v7 = vpop.permute.xlu1 %467 }
 0x4b6   :  { %v3455_v8 = vadd.f32 %v468_v7, %v460_v5  ;;  %v2244_v5 = vrot.slane %v3422_v46, 1 }
 0x4b8   :  { %3105 = vtanh.f32 %v3455_v8  ;;  %v494_v33 = vrot.slane %v3455_v8, 4  ;;  %v1249_v8 = vld [vmem:[%s4005_s7 + $0x10] sm:$0xff] }
 0x4c2   :  { %v3106_v10 = vpop.eup %3105 }
 0x4c3   :  { %473 = vrot.lane.b32.xlu0 %v3106_v10, %s3262_s5  ;;  %v2492_v10 = vrot.slane %v3422_v46, 3 }
 0x535   :  { %v474_v13 = vpop.permute.xlu0 %473 }
 0x536   :  { %v476_v14 = vmul.f32 %v474_v13, %v456_v1 }
 0x538   :  { %v3459_v16 = vrot.slane %v476_v14, 4  ;;  %v2368_v14 = vrot.slane %v3422_v46, 2 }
 0x53a   :  { %485 = vrot.lane.b32.xlu1 %v3459_v16, %s3263_s26  ;;  %v2493_v0 = vrot.slane %v3459_v16, 2  ;;  %v2122_v1 = vrot.slane %v3459_v16, 7  ;;  %v2369_v2 = vrot.slane %v3459_v16, 1 }
 0x5ac   :  { %v3463_v17 = vpop.permute.xlu1 %485 }
 0x5ad   :  { %2810 = vmatmul.mubr.msk.f32.vlgmr.msra.gmra.mrb[6].mxu0 %vm262_vm5, %v3463_v17 }
 0x5ae   :  { %3001 = vmatpush3.bf16.msra.mxu0 %v3338_v6  ;;  %2831 = vmatprep.mubr.msk.f32.mxu0 %vm3260_vm1, %v3261_v12 }
 0x5af   :  { %3002 = vmatprep.subr.bf16.mxu0 %v3259_v9 }
 0x5b2   :  { %3004 = vmatpush3.bf16.msra.mxu0 %v3353_v11 }
 0x5b3   :  { %3011 = vmatprep.subr.bf16.mxu0 %v3259_v9 }
 0x680   :  { %v571_v19 = vpop.f32.mrb[6].mxu0 }
 0x681   :  { %v575_v21 = vadd.f32 %v571_v19, %v3371_v15  ;;  %v2811_v22 = vpop.f32.mrb[7].mxu0 }
 0x682   :  { %v2494_v22 = vsel %vm2100_vm6, %v2493_v0, %v2492_v10 }
 0x683   :  { %v2630_v23 = vmul.f32 -1.442695, %v575_v21 }
 0x685   :  { %3107 = vpow2.f32 %v2630_v23  ;;  %v2245_v23 = vsel %vm2100_vm6, %v3459_v16, %v2244_v5 }
 0x686   :  { %3109 = vtanh.f32 %v575_v21 }
 0x68f   :  { %v3108_v24 = vpop.eup %3107 }
 0x690   :  { %v580_v25 = vadd.f32 1.0, %v3108_v24  ;;  %v3110_v26 = vpop.eup %3109  ;;  %v2123_v24 = vsel %vm2100_vm6, %v2122_v1, %v3422_v46 }
 0x692   :  { %3111 = vrcp.f32 %v580_v25  ;;  %v2370_v25 = vsel %vm2100_vm6, %v2369_v2, %v2368_v14 }
 0x69c   :  { %v3112_v27 = vpop.eup %3111 }
 0x69d   :  { %v583_v28 = vsel %vm3384_vm4, %v3110_v26, %v3112_v27 }
 0x69e   :  { %587 = vrot.lane.b32.xlu0 %v583_v28, %s3262_s5  ;;  %v585_v34 = vmul.f32 %v583_v28, %v494_v33 }
 0x710   :  { %v588_v31 = vpop.permute.xlu0 %587 }
 0x711   :  { %v590_v32 = vmul.f32 %v588_v31, %v583_v28 }
 0x713   :  { %592 = vrot.lane.b32.xlu1 %v590_v32, %s3263_s26 }
 0x785   :  { %v593_v35 = vpop.permute.xlu1 %592 }
 0x786   :  { %v3481_v36 = vadd.f32 %v593_v35, %v585_v34 }
 0x788   :  { %3113 = vtanh.f32 %v3481_v36  ;;  %v706_v60 = vrot.slane %v3481_v36, 4 }
 0x792   :  { %v3114_v37 = vpop.eup %3113 }
 0x793   :  { %598 = vrot.lane.b32.xlu0 %v3114_v37, %s3262_s5 }
 0x805   :  { %v599_v39 = vpop.permute.xlu0 %598 }
 0x806   :  { %v3485_v40 = vmul.f32 %v599_v39, %v583_v28 }
 0x808   :  { %619 = vrot.lane.b32.xlu1 %v3485_v40, %s3263_s26  ;;  %v2495_v4 = vrot.slane %v3485_v40, 1  ;;  %v2124_v13 = vrot.slane %v3485_v40, 6  ;;  %v2246_v19 = vrot.slane %v3485_v40, 7  ;;  %v2371_v16 = vsel %vm2103_vm8, %v3485_v40, %v2370_v25 }
 0x80a   :  { %v2496_v26 = vsel %vm2103_vm8, %v2495_v4, %v2494_v22  ;;  %v2125_v34 = vsel %vm2103_vm8, %v2124_v13, %v2123_v24  ;;  %v2247_v35 = vsel %vm2103_vm8, %v2246_v19, %v2245_v23 }
 0x87a   :  { %v620_v41 = vpop.permute.xlu1 %619 }
 0x87b   :  { %2821 = vmatmul.mubr.msk.f32.vlgmr.msra.gmra.mrb[6].mxu1 %vm262_vm5, %v620_v41 }
 0x87c   :  { %3007 = vmatpush3.bf16.msra.mxu1 %v3338_v6  ;;  %2842 = vmatprep.mubr.msk.f32.mxu1 %vm3260_vm1, %v3261_v12 }
 0x87d   :  { %3008 = vmatprep.subr.bf16.mxu1 %v3259_v9 }
 0x880   :  { %3010 = vmatpush3.bf16.msra.mxu1 %v3353_v11 }
 0x881   :  { %3017 = vmatprep.subr.bf16.mxu1 %v3259_v9 }
 0x94e   :  { %v689_v42 = vpop.f32.mrb[6].mxu1 }
 0x94f   :  { %v694_v43 = vrot.slane %v689_v42, 4  ;;  %v2822_v44 = vpop.f32.mrb[7].mxu1 }
 0x951   :  { %v696_v45 = vadd.f32 %v694_v43, %v3371_v15 }
 0x953   :  { %v2632_v48 = vmul.f32 -1.442695, %v696_v45 }
 0x955   :  { %3115 = vpow2.f32 %v2632_v48 }
 0x956   :  { %3117 = vtanh.f32 %v696_v45 }
 0x95f   :  { %v3116_v51 = vpop.eup %3115 }
 0x960   :  { %v701_v53 = vadd.f32 1.0, %v3116_v51  ;;  %v3118_v55 = vpop.eup %3117 }
 0x962   :  { %3119 = vrcp.f32 %v701_v53 }
 0x96c   :  { %v3120_v56 = vpop.eup %3119 }
 0x96d   :  { %v704_v57 = vsel %vm3384_vm4, %v3118_v55, %v3120_v56 }
 0x96e   :  { %710 = vrot.lane.b32.xlu0 %v704_v57, %s3262_s5  ;;  %v708_v15 = vmul.f32 %v706_v60, %v704_v57 }
 0x9e0   :  { %v711_v58 = vpop.permute.xlu0 %710 }
 0x9e1   :  { %v713_v59 = vmul.f32 %v711_v58, %v704_v57 }
 0x9e3   :  { %715 = vrot.lane.b32.xlu1 %v713_v59, %s3263_s26 }
 0xa55   :  { %v716_v61 = vpop.permute.xlu1 %715 }
 0xa56   :  { %v3502_v62 = vadd.f32 %v716_v61, %v708_v15 }
 0xa58   :  { %3121 = vtanh.f32 %v3502_v62  ;;  %v742_v60 = vrot.slane %v3502_v62, 4 }
 0xa62   :  { %v3122_v63 = vpop.eup %3121 }
 0xa63   :  { %721 = vrot.lane.b32.xlu0 %v3122_v63, %s3262_s5 }
 0xad5   :  { %v722_v3 = vpop.permute.xlu0 %721 }
 0xad6   :  { %v724_v7 = vmul.f32 %v722_v3, %v704_v57 }
 0xad8   :  { %v732_v21 = vrot.slane %v724_v7, 4 }
 0xada   :  { %v2126_v27 = vrot.slane %v732_v21, 5  ;;  %v2248_v28 = vrot.slane %v732_v21, 6  ;;  %v2372_v31 = vrot.slane %v732_v21, 7  ;;  %733 = vrot.lane.b32.xlu1 %v732_v21, %s3263_s26  ;;  %v3524_v32 = vsel %vm2106_vm7, %v732_v21, %v2496_v26 }
 0xadc   :  { %v3531_v37 = vsel %vm2106_vm7, %v2126_v27, %v2125_v34  ;;  %v3534_v39 = vsel %vm2106_vm7, %v2372_v31, %v2371_v16  ;;  %v3537_v41 = vsel %vm2106_vm7, %v2248_v28, %v2247_v35 }
 0xb4c   :  { %v3539_v42 = vpop.permute.xlu1 %733 }
 0xb4d   :  { %2832 = vmatmul.mubr.msk.f32.vlgmr.msra.gmra.mrb[8].mxu0 %vm262_vm5, %v3539_v42 }
 0xb4e   :  { %3013 = vmatpush3.bf16.msra.mxu0 %v3338_v6  ;;  %2853 = vmatprep.mubr.msk.f32.mxu0 %vm3260_vm1, %v3261_v12 }
 0xb4f   :  { %3014 = vmatprep.subr.bf16.mxu0 %v3259_v9 }
 0xb52   :  { %3016 = vmatpush3.bf16.msra.mxu0 %v3353_v11 }
 0xb53   :  { %3023 = vmatprep.subr.bf16.mxu0 %v3259_v9 }
 0xc20   :  { %v819_v43 = vpop.f32.mrb[8].mxu0 }
 0xc21   :  { %v823_v44 = vadd.f32 %v819_v43, %v3375_v20  ;;  %v2833_v45 = vpop.f32.mrb[9].mxu0 }
 0xc23   :  { %v2634_v48 = vmul.f32 -1.442695, %v823_v44 }
 0xc25   :  { %3123 = vpow2.f32 %v2634_v48 }
 0xc26   :  { %3125 = vtanh.f32 %v823_v44 }
 0xc2f   :  { %v3124_v51 = vpop.eup %3123 }
 0xc30   :  { %v828_v53 = vadd.f32 1.0, %v3124_v51  ;;  %v3126_v55 = vpop.eup %3125 }
 0xc32   :  { %3127 = vrcp.f32 %v828_v53 }
 0xc3c   :  { %v3128_v56 = vpop.eup %3127 }
 0xc3d   :  { %v831_v57 = vsel %vm3384_vm4, %v3126_v55, %v3128_v56 }
 0xc3e   :  { %835 = vrot.lane.b32.xlu0 %v831_v57, %s3262_s5  ;;  %v833_v15 = vmul.f32 %v831_v57, %v742_v60 }
 0xcb0   :  { %v836_v58 = vpop.permute.xlu0 %835 }
 0xcb1   :  { %v838_v59 = vmul.f32 %v836_v58, %v831_v57 }
 0xcb3   :  { %840 = vrot.lane.b32.xlu1 %v838_v59, %s3263_s26 }
 0xd25   :  { %v841_v61 = vpop.permute.xlu1 %840 }
 0xd26   :  { %v3557_v63 = vadd.f32 %v841_v61, %v833_v15 }
 0xd28   :  { %3129 = vtanh.f32 %v3557_v63  ;;  %v954_v24 = vrot.slane %v3557_v63, 4 }
 0xd32   :  { %v3130_v0 = vpop.eup %3129 }
 0xd33   :  { %846 = vrot.lane.b32.xlu0 %v3130_v0, %s3262_s5 }
 0xda5   :  { %v847_v1 = vpop.permute.xlu0 %846 }
 0xda6   :  { %v3561_v2 = vmul.f32 %v847_v1, %v831_v57 }
 0xda8   :  { %867 = vrot.lane.b32.xlu1 %v3561_v2, %s3263_s26  ;;  %v2128_v34 = vrot.slane %v3561_v2, 4  ;;  %v2374_v16 = vrot.slane %v3561_v2, 6  ;;  %v2250_v35 = vrot.slane %v3561_v2, 5  ;;  %v2498_v43 = vrot.slane %v3561_v2, 7 }
 0xdaa   :  { %v2129_v55 = vsel %vm2109_vm9, %v2128_v34, %v3531_v37  ;;  %v2375_v56 = vsel %vm2109_vm9, %v2374_v16, %v3534_v39  ;;  %v2251_v57 = vsel %vm2109_vm9, %v2250_v35, %v3537_v41  ;;  %v2499_v58 = vsel %vm2109_vm9, %v2498_v43, %v3524_v32 }
 0xe1a   :  { %v868_v3 = vpop.permute.xlu1 %867 }
 0xe1b   :  { %2843 = vmatmul.mubr.msk.f32.vlgmr.msra.gmra.mrb[8].mxu1 %vm262_vm5, %v868_v3 }
 0xe1c   :  { %3019 = vmatpush3.bf16.msra.mxu1 %v3338_v6  ;;  %2864 = vmatprep.mubr.msk.f32.mxu1 %vm3260_vm1, %v3261_v12 }
 0xe1d   :  { %3020 = vmatprep.subr.bf16.mxu1 %v3259_v9 }
 0xe20   :  { %3022 = vmatpush3.bf16.msra.mxu1 %v3353_v11 }
 0xe21   :  { %3029 = vmatprep.subr.bf16.mxu1 %v3259_v9 }
 0xeee   :  { %v937_v4 = vpop.f32.mrb[8].mxu1 }
 0xeef   :  { %v942_v5 = vrot.slane %v937_v4, 4  ;;  %v2844_v7 = vpop.f32.mrb[9].mxu1 }
 0xef1   :  { %v944_v10 = vadd.f32 %v942_v5, %v3375_v20 }
 0xef3   :  { %v2636_v13 = vmul.f32 -1.442695, %v944_v10 }
 0xef5   :  { %3131 = vpow2.f32 %v2636_v13 }
 0xef6   :  { %3133 = vtanh.f32 %v944_v10 }
 0xeff   :  { %v3132_v14 = vpop.eup %3131 }
 0xf00   :  { %v949_v19 = vadd.f32 1.0, %v3132_v14  ;;  %v3134_v6 = vpop.eup %3133 }
 0xf02   :  { %3135 = vrcp.f32 %v949_v19  ;;  %v3621_v19 = vld [vmem:[%s3998_s0] sm:$0xf]  ;;  %s3265_s0 = smov 96  }
 0xf03   :  { %3071 = vpush %v3621_v19  ;;  %vm362_vm11 = vcmp.eq.s32.totalorder %v3621_v19, 1  ;;  %vm602_vm12 = vcmp.eq.s32.totalorder %v3621_v19, 3  ;;  %vm725_vm13 = vcmp.eq.s32.totalorder %v3621_v19, 4  ;;  %vm477_vm14 = vcmp.eq.s32.totalorder %v3621_v19, 2 }
 0xf0c   :  { %v3136_v21 = vpop.eup %3135 }
 0xf0d   :  { %v952_v22 = vsel %vm3384_vm4, %v3134_v6, %v3136_v21  ;;  %v3264_v6 = vmov 0  }
 0xf0e   :  { %958 = vrot.lane.b32.xlu0 %v952_v22, %s3262_s5  ;;  %v956_v20 = vmul.f32 %v954_v24, %v952_v22  ;;  %3090 = vset.pattern.permute.xlu1 %v3264_v6  ;;  %v478_v34 = vsel %vm477_vm14, 1, %v3264_v6  ;;  %vm1098_vm14 = vcmp.eq.s32.totalorder %v3621_v19, 7 }
 0xf0f   :  { %3089 = vset.pattern.permute.xlu0 %v3264_v6 }
 0xf80   :  { %v959_v11 = vpop.permute.xlu0 %958 }
 0xf81   :  { %v961_v23 = vmul.f32 %v959_v11, %v952_v22 }
 0xf83   :  { %963 = vrot.lane.b32.xlu1 %v961_v23, %s3263_s26 }
 0xff5   :  { %v964_v25 = vpop.permute.xlu1 %963 }
 0xff6   :  { %v3578_v26 = vadd.f32 %v964_v25, %v956_v20  ;;  %v363_v20 = vsel %vm362_vm11, 1, %v3264_v6  ;;  %v603_v25 = vsel %vm602_vm12, 1, %v3264_v6  ;;  %vm850_vm11 = vcmp.eq.s32.totalorder %v3621_v19, 5 }
 0xff8   :  { %3137 = vtanh.f32 %v3578_v26  ;;  %v990_v21 = vrot.slane %v3578_v26, 4 }
0x1002   :  { %v3138_v27 = vpop.eup %3137 }
0x1003   :  { %969 = vrot.lane.b32.xlu0 %v3138_v27, %s3262_s5  ;;  %v726_v27 = vsel %vm725_vm13, 1, %v3264_v6  ;;  %vm973_vm13 = vcmp.eq.s32.totalorder %v3621_v19, 6 }
0x1075   :  { %v970_v28 = vpop.permute.xlu0 %969 }
0x1076   :  { %v972_v31 = vmul.f32 %v970_v28, %v952_v22 }
0x1078   :  { %v980_v44 = vrot.slane %v972_v31, 4 }
0x107a   :  { %981 = vrot.lane.b32.xlu1 %v980_v44, %s3263_s26  ;;  %v2130_v45 = vrot.slane %v980_v44, 3  ;;  %v2376_v48 = vrot.slane %v980_v44, 5  ;;  %v2252_v51 = vrot.slane %v980_v44, 4  ;;  %v2500_v53 = vrot.slane %v980_v44, 6 }
0x107c   :  { %v3596_v59 = vsel %vm4009_vm10, %v2130_v45, %v2129_v55  ;;  %v3599_v15 = vsel %vm4009_vm10, %v2376_v48, %v2375_v56  ;;  %v3602_v61 = vsel %vm4009_vm10, %v2252_v51, %v2251_v57  ;;  %v3605_v37 = vsel %vm4009_vm10, %v2500_v53, %v2499_v58 }
0x107d   :  { %v851_v55 = vsel %vm850_vm11, 1, %v3264_v6 }
0x10ec   :  { %v3607_v0 = vpop.permute.xlu1 %981 }
0x10ed   :  { %2854 = vmatmul.mubr.msk.f32.vlgmr.msra.gmra.mrb[10].mxu0 %vm262_vm5, %v3607_v0 }
0x10ee   :  { %2875 = vmatprep.mubr.msk.f32.mxu0 %vm3260_vm1, %v3261_v12 }
0x11c0   :  { %v1067_v32 = vpop.f32.mrb[10].mxu0 }
0x11c1   :  { %v1071_v39 = vadd.f32 %v1067_v32, %v3373_v18  ;;  %v2855_v41 = vpop.f32.mrb[11].mxu0 }
0x11c3   :  { %v2638_v1 = vmul.f32 -1.442695, %v1071_v39 }
0x11c5   :  { %3139 = vpow2.f32 %v2638_v1 }
0x11c6   :  { %3141 = vtanh.f32 %v1071_v39 }
0x11cf   :  { %v3140_v3 = vpop.eup %3139 }
0x11d0   :  { %v1076_v4 = vadd.f32 1.0, %v3140_v3  ;;  %v3142_v5 = vpop.eup %3141 }
0x11d2   :  { %3143 = vrcp.f32 %v1076_v4 }
0x11dc   :  { %v3144_v7 = vpop.eup %3143 }
0x11dd   :  { %v1079_v10 = vsel %vm3384_vm4, %v3142_v5, %v3144_v7  ;;  %v974_v7 = vsel %vm973_vm13, 1, %v3264_v6 }
0x11de   :  { %1083 = vrot.lane.b32.xlu0 %v1079_v10, %s3262_s5  ;;  %v1081_v22 = vmul.f32 %v1079_v10, %v990_v21 }
0x1250   :  { %v1084_v13 = vpop.permute.xlu0 %1083 }
0x1251   :  { %v1086_v14 = vmul.f32 %v1084_v13, %v1079_v10 }
0x1253   :  { %1088 = vrot.lane.b32.xlu1 %v1086_v14, %s3263_s26 }
0x12c5   :  { %v1089_v11 = vpop.permute.xlu1 %1088 }
0x12c6   :  { %v3629_v23 = vadd.f32 %v1089_v11, %v1081_v22 }
0x12c8   :  { %3145 = vtanh.f32 %v3629_v23 }
0x12d2   :  { %v3146_v24 = vpop.eup %3145 }
0x12d3   :  { %1094 = vrot.lane.b32.xlu0 %v3146_v24, %s3262_s5  ;;  %v1202_v24 = vrot.slane %v3629_v23, 4 }
0x12d7   :  { %365 = vperm.xlu0 %3089, %v363_v20  }
0x12db   :  { %605 = vperm.xlu0 %3089, %v603_v25  }
0x12df   :  { %728 = vperm.xlu0 %3089, %v726_v27  }
0x1345   :  { %v1095_v28 = vpop.permute.xlu0 %1094 }
0x1346   :  { %v3639_v31 = vmul.f32 %v1095_v28, %v1079_v10  ;;  %v1099_v10 = vsel %vm1098_vm14, 1, %v3264_v6  ;;  %vm1221_vm14 = vcmp.eq.s32.totalorder %v3621_v19, 8 }
0x1348   :  { %1115 = vrot.lane.b32.xlu1 %v3639_v31, %s3263_s26 }
0x134c   :  { %480 = vperm.xlu1 %3090, %v478_v34  }
0x1356   :  { %v3645_v16 = vpop.permute.xlu0 %365 }
0x1357   :  { %vm367_vm15 = vcmp.eq.s32.totalorder %v3645_v16, 1  ;;  %v1248_v16 = vld [vmem:[%s4005_s7 + $0x8] sm:$0xff] }
0x1358   :  { %v368_v35 = vsel %vm367_vm15, %v3422_v46, 0.0 }
0x1359   :  { %489 = vrot.lane.b32.xlu1 %v368_v35, %s3263_s26 }
0x135a   :  { %v3662_v46 = vpop.permute.xlu0 %605 }
0x135b   :  { %vm607_vm3 = vcmp.eq.s32.totalorder %v3662_v46, 1 }
0x135e   :  { %v3675_v4 = vpop.permute.xlu0 %728 }
0x135f   :  { %vm730_vm12 = vcmp.eq.s32.totalorder %v3675_v4, 1 }
0x13ba   :  { %v1116_v43 = vpop.permute.xlu1 %1115 }
0x13bb   :  { %2865 = vmatmul.mubr.msk.f32.vlgmr.msra.gmra.mrb[10].mxu1 %vm262_vm5, %v1116_v43  ;;  %v369_v43 = vsel %vm367_vm15, %v3392_v38, 0.0 }
0x13bc   :  { %2886 = vmatprep.mubr.msk.f32.mxu1 %vm3260_vm1, %v3261_v12 }
0x13cb   :  { %v3655_v44 = vpop.permute.xlu1 %480 }
0x13cc   :  { %vm482_vm2 = vcmp.eq.s32.totalorder %v3655_v44, 1 }
0x13cf   :  { %v490_v45 = vpop.permute.xlu1 %489 }
0x13d0   :  { %v492_v48 = vsel %vm482_vm2, %v3463_v17, %v490_v45  ;;  %v1222_v45 = vsel %vm1221_vm14, 1, %v3264_v6  ;;  %vm2115_vm14 = vcmask 1046534  }
0x13d1   :  { %609 = vrot.lane.b32.xlu1 %v492_v48, %s3265_s0 }
0x1443   :  { %v610_v51 = vpop.permute.xlu1 %609 }
0x1444   :  { %v612_v53 = vsel %vm607_vm3, %v3485_v40, %v610_v51 }
0x1445   :  { %737 = vrot.lane.b32.xlu1 %v612_v53, %s3263_s26 }
0x1449   :  { %853 = vperm.xlu1 %3090, %v851_v55  }
0x148e   :  { %v1185_v17 = vpop.f32.mrb[10].mxu1 }
0x148f   :  { %v1190_v56 = vrot.slane %v1185_v17, 4  ;;  %v2866_v57 = vpop.f32.mrb[11].mxu1 }
0x1490   :  { %v2378_v57 = vrot.slane %v3639_v31, 4 }
0x1491   :  { %v1192_v58 = vadd.f32 %v1190_v56, %v3373_v18  ;;  %v2132_v56 = vrot.slane %v3639_v31, 2 }
0x1493   :  { %v2640_v32 = vmul.f32 -1.442695, %v1192_v58 }
0x1495   :  { %3147 = vpow2.f32 %v2640_v32 }
0x1496   :  { %3149 = vtanh.f32 %v1192_v58  ;;  %v2254_v58 = vrot.slane %v3639_v31, 3 }
0x149f   :  { %v3148_v39 = vpop.eup %3147 }
0x14a0   :  { %v1197_v41 = vadd.f32 1.0, %v3148_v39  ;;  %v3150_v1 = vpop.eup %3149  ;;  %v2502_v39 = vrot.slane %v3639_v31, 5 }
0x14a2   :  { %3151 = vrcp.f32 %v1197_v41 }
0x14ac   :  { %v3152_v3 = vpop.eup %3151 }
0x14ad   :  { %v1200_v40 = vsel %vm3384_vm4, %v3150_v1, %v3152_v3 }
0x14ae   :  { %1206 = vrot.lane.b32.xlu0 %v1200_v40, %s3262_s5  ;;  %v1204_v20 = vmul.f32 %v1202_v24, %v1200_v40 }
0x14b7   :  { %v738_v5 = vpop.permute.xlu1 %737 }
0x14b8   :  { %v740_v18 = vsel %vm730_vm12, %v3539_v42, %v738_v5  ;;  %v2133_v5 = vsel %vm2115_vm14, %v2132_v56, %v3596_v59  ;;  %v2503_v59 = vsel %vm2115_vm14, %v2502_v39, %v3605_v37 }
0x14b9   :  { %857 = vrot.lane.b32.xlu0 %v740_v18, %s3265_s0  ;;  %v2379_v18 = vsel %vm2115_vm14, %v2378_v57, %v3599_v15 }
0x14bd   :  { %976 = vperm.xlu0 %3089, %v974_v7  }
0x14c1   :  { %1101 = vperm.xlu0 %3089, %v1099_v10  }
0x14c8   :  { %v3687_v22 = vpop.permute.xlu1 %853 }
0x14c9   :  { %vm855_vm11 = vcmp.eq.s32.totalorder %v3687_v22, 1 }
0x1520   :  { %v1207_v13 = vpop.permute.xlu0 %1206 }
0x1521   :  { %v1209_v14 = vmul.f32 %v1207_v13, %v1200_v40 }
0x1523   :  { %1211 = vrot.lane.b32.xlu1 %v1209_v14, %s3263_s26 }
0x152b   :  { %v858_v11 = vpop.permute.xlu0 %857 }
0x152c   :  { %v860_v42 = vsel %vm855_vm11, %v3561_v2, %v858_v11 }
0x152d   :  { %985 = vrot.lane.b32.xlu1 %v860_v42, %s3263_s26 }
0x153c   :  { %v3698_v28 = vpop.permute.xlu0 %976 }
0x153d   :  { %vm978_vm13 = vcmp.eq.s32.totalorder %v3698_v28, 1 }
0x1540   :  { %v3739_v48 = vpop.permute.xlu0 %1101 }
0x1541   :  { %vm1103_vm15 = vcmp.eq.s32.totalorder %v3739_v48, 1 }
0x1595   :  { %v1212_v25 = vpop.permute.xlu1 %1211 }
0x1596   :  { %v3695_v27 = vadd.f32 %v1212_v25, %v1204_v20 }
0x1598   :  { %3153 = vtanh.f32 %v3695_v27  ;;  %v1238_v4 = vrot.slane %v3695_v27, 4 }
0x159f   :  { %v986_v34 = vpop.permute.xlu1 %985 }
0x15a0   :  { %v988_v35 = vsel %vm978_vm13, %v3607_v0, %v986_v34  ;;  %v1247_v0 = vld [vmem:[%s4005_s7] sm:$0xff] }
0x15a1   :  { %1105 = vrot.lane.b32.xlu0 %v988_v35, %s3265_s0  ;;  %v3721_v38 = vpack.c.bf16 %v1248_v16, %v1247_v0 }
0x15a2   :  { %v3154_v2 = vpop.eup %3153 }
0x15a3   :  { %1217 = vrot.lane.b32.xlu1 %v3154_v2, %s3262_s5  ;;  %3025 = vmatpush3.bf16.msra.mxu0 %v3721_v38 }
0x15a4   :  { %3031 = vmatpush3.bf16.msra.mxu1 %v3721_v38  ;;  %3026 = vmatprep.subr.bf16.mxu0 %v3259_v9 }
0x15a5   :  { %499 = vrot.lane.b32.xlu0 %v369_v43, %s3265_s0  ;;  %3032 = vmatprep.subr.bf16.mxu1 %v3259_v9 }
0x15a7   :  { %495 = vrot.lane.b32.xlu1 %v494_v33, %s3265_s0  ;;  %v1250_v33 = vld [vmem:[%s4005_s7 + $0x18] sm:$0xff]  ;;  %s3072_s7 = spop %3071 }
0x15a8   :  { %v3733_v6 = vpack.c.bf16 %v1250_v33, %v1249_v8 }
0x15aa   :  { %3028 = vmatpush3.bf16.msra.mxu0 %v3733_v6  ;;  %3034 = vmatpush3.bf16.msra.mxu1 %v3733_v6 }
0x15ab   :  { %1224 = vperm.xlu1 %3090, %v1222_v45   ;;  %3035 = vmatprep.subr.bf16.mxu0 %v3259_v9 }
0x15ac   :  { %3041 = vmatprep.subr.bf16.mxu1 %v3259_v9 }
0x1613   :  { %v1106_v51 = vpop.permute.xlu0 %1105 }
0x1614   :  { %v1108_v53 = vsel %vm1103_vm15, %v3639_v31, %v1106_v51  ;;  %v2255_v31 = vsel %vm2115_vm14, %v2254_v58, %v3602_v61 }
0x1615   :  { %v1218_v55 = vpop.permute.xlu1 %1217  ;;  %1233 = vrot.lane.b32.xlu1 %v1108_v53, %s3263_s26 }
0x1616   :  { %v1220_v17 = vmul.f32 %v1218_v55, %v1200_v40 }
0x1617   :  { %v500_v10 = vpop.permute.xlu0 %499 }
0x1618   :  { %v1228_v32 = vrot.slane %v1220_v17, 4 }
0x1619   :  { %743 = vrot.lane.b32.xlu1 %v742_v60, %s3265_s0  ;;  %v496_v41 = vpop.permute.xlu1 %495 }
0x161a   :  { %1229 = vrot.lane.b32.xlu0 %v1228_v32, %s3263_s26  ;;  %v2134_v1 = vrot.slane %v1228_v32, 1  ;;  %v2380_v3 = vrot.slane %v1228_v32, 3  ;;  %v2256_v40 = vrot.slane %v1228_v32, 2  ;;  %v2504_v7 = vrot.slane %v1228_v32, 4 }
0x161b   :  { %v502_v15 = vsel %vm482_vm2, %v496_v41, %v500_v10 }
0x161c   :  { %v3761_v62 = vsel %vm2118_vm0, %v2134_v1, %v2133_v5  ;;  %v3764_v60 = vsel %vm2118_vm0, %v2380_v3, %v2379_v18  ;;  %v3767_v13 = vsel %vm2118_vm0, %v2256_v40, %v2255_v31  ;;  %v3774_v14 = vsel %vm2118_vm0, %v2504_v7, %v2503_v59 }
0x161e   :  { %614 = vrot.lane.b32.xlu0 %v502_v15, %s3263_s26 }
0x162a   :  { %v1225_v61 = vpop.permute.xlu1 %1224 }
0x162b   :  { %vm1226_vm10 = vcmp.eq.s32.totalorder %v1225_v61, 1 }
0x1687   :  { %v1234_v11 = vpop.permute.xlu1 %1233 }
0x168b   :  { %v744_v20 = vpop.permute.xlu1 %743 }
0x168c   :  { %v1230_v42 = vpop.permute.xlu0 %1229 }
0x168d   :  { %v1236_v24 = vsel %vm1226_vm10, %v1230_v42, %v1234_v11 }
0x168e   :  { %2876 = vmatmul.mubr.msk.f32.vlgmr.msra.gmra.mrb[12].mxu0 %vm262_vm5, %v1236_v24 }
0x168f   :  { %3037 = vmatpush3.bf16.msra.mxu0 %v3721_v38  ;;  %2897 = vmatprep.mubr.msk.f32.mxu0 %vm3260_vm1, %v3261_v12 }
0x1690   :  { %v615_v37 = vpop.permute.xlu0 %614  ;;  %3038 = vmatprep.subr.bf16.mxu0 %v3259_v9 }
0x1691   :  { %v617_v44 = vsel %vm607_vm3, %v3481_v36, %v615_v37  ;;  %v235_v36 = vadd.f32 %v3429_v47, %v3434_v50 }
0x1692   :  { %747 = vrot.lane.b32.xlu0 %v617_v44, %s3265_s0 }
0x1693   :  { %3040 = vmatpush3.bf16.msra.mxu0 %v3733_v6 }
0x1694   :  { %3047 = vmatprep.subr.bf16.mxu0 %v3259_v9 }
0x1696   :  { %991 = vrot.lane.b32.xlu0 %v990_v21, %s3265_s0 }
0x1704   :  { %v748_v25 = vpop.permute.xlu0 %747 }
0x1705   :  { %v750_v34 = vsel %vm730_vm12, %v744_v20, %v748_v25 }
0x1706   :  { %862 = vrot.lane.b32.xlu1 %v750_v34, %s3263_s26 }
0x1708   :  { %v992_v8 = vpop.permute.xlu0 %991 }
0x1761   :  { %v1320_v46 = vpop.f32.mrb[12].mxu0 }
0x1762   :  { %v1324_v35 = vadd.f32 %v1320_v46, %v235_v36  ;;  %v2877_v2 = vpop.f32.mrb[13].mxu0 }
0x1764   :  { %v2642_v43 = vmul.f32 -1.442695, %v1324_v35 }
0x1766   :  { %3155 = vpow2.f32 %v2642_v43 }
0x1770   :  { %v3156_v45 = vpop.eup %3155 }
0x1771   :  { %v1329_v0 = vadd.f32 1.0, %v3156_v45 }
0x1773   :  { %3157 = vrcp.f32 %v1329_v0 }
0x1774   :  { %3159 = vtanh.f32 %v1324_v35 }
0x1778   :  { %v863_v26 = vpop.permute.xlu1 %862 }
0x1779   :  { %v865_v21 = vsel %vm855_vm11, %v3557_v63, %v863_v26 }
0x177a   :  { %995 = vrot.lane.b32.xlu1 %v865_v21, %s3265_s0 }
0x177d   :  { %v3158_v16 = vpop.eup %3157 }
0x177e   :  { %1239 = vrot.lane.b32.xlu1 %v1238_v4, %s3265_s0  ;;  %v3160_v47 = vpop.eup %3159 }
0x177f   :  { %v1332_v50 = vsel %vm3384_vm4, %v3160_v47, %v3158_v16 }
0x1782   :  { %1339 = vrot.lane.b32.xlu1 %v1332_v50, %s3262_s5 }
0x17ec   :  { %v996_v33 = vpop.permute.xlu1 %995 }
0x17ed   :  { %v998_v51 = vsel %vm978_vm13, %v992_v8, %v996_v33 }
0x17ee   :  { %1110 = vrot.lane.b32.xlu0 %v998_v51, %s3263_s26 }
0x17f0   :  { %v1240_v63 = vpop.permute.xlu1 %1239 }
0x17f4   :  { %v1340_v22 = vpop.permute.xlu1 %1339 }
0x17f5   :  { %v1342_v53 = vmul.f32 %v1340_v22, %v1332_v50 }
0x17f7   :  { %1344 = vrot.lane.b32.xlu1 %v1342_v53, %s3263_s26 }
0x1860   :  { %v1111_v27 = vpop.permute.xlu0 %1110 }
0x1861   :  { %v1113_v55 = vsel %vm1103_vm15, %v3629_v23, %v1111_v27 }
0x1862   :  { %1243 = vrot.lane.b32.xlu0 %v1113_v55, %s3265_s0 }
0x1869   :  { %v1345_v58 = vpop.permute.xlu1 %1344 }
0x18d4   :  { %v1244_v17 = vpop.permute.xlu0 %1243 }
0x18d5   :  { %v1246_v56 = vsel %vm1226_vm10, %v1240_v63, %v1244_v17 }
0x18d6   :  { %1334 = vrot.lane.b32.xlu0 %v1246_v56, %s3263_s26 }
0x1948   :  { %v1335_v28 = vpop.permute.xlu0 %1334 }
0x1949   :  { %v1337_v57 = vmul.f32 %v1335_v28, %v1332_v50 }
0x194b   :  { %v1347_v32 = vadd.f32 %v1345_v58, %v1337_v57 }
0x194d   :  { %3161 = vtanh.f32 %v1347_v32  ;;  %v1442_v42 = vrot.slane %v1347_v32, 4 }
0x1957   :  { %v3162_v39 = vpop.eup %3161 }
0x1958   :  { %1350 = vrot.lane.b32.xlu0 %v3162_v39, %s3262_s5 }
0x19ca   :  { %v1351_v41 = vpop.permute.xlu0 %1350 }
0x19cb   :  { %v3817_v1 = vmul.f32 %v1351_v41, %v1332_v50 }
0x19cd   :  { %1355 = vrot.lane.b32.xlu1 %v3817_v1, %s3263_s26  ;;  %v2352_v27 = vrot.slane %v3817_v1, 2  ;;  %v2228_v57 = vrot.slane %v3817_v1, 1  ;;  %v2476_v58 = vrot.slane %v3817_v1, 3 }
0x1a3f   :  { %v1356_v23 = vpop.permute.xlu1 %1355 }
0x1a40   :  { %2887 = vmatmul.mubr.msk.f32.vlgmr.msra.gmra.mrb[12].mxu1 %vm262_vm5, %v1356_v23 }
0x1a41   :  { %3043 = vmatpush3.bf16.msra.mxu1 %v3721_v38  ;;  %2908 = vmatprep.mubr.msk.f32.mxu1 %vm3260_vm1, %v3261_v12 }
0x1a42   :  { %3044 = vmatprep.subr.bf16.mxu1 %v3259_v9 }
0x1a45   :  { %3046 = vmatpush3.bf16.msra.mxu1 %v3733_v6 }
0x1a46   :  { %3053 = vmatprep.subr.bf16.mxu1 %v3259_v9 }
0x1b13   :  { %v1425_v48 = vpop.f32.mrb[12].mxu1 }
0x1b14   :  { %v1430_v3 = vrot.slane %v1425_v48, 4  ;;  %v2888_v40 = vpop.f32.mrb[13].mxu1 }
0x1b16   :  { %v1432_v5 = vadd.f32 %v1430_v3, %v235_v36 }
0x1b18   :  { %v2644_v18 = vmul.f32 -1.442695, %v1432_v5 }
0x1b1a   :  { %3163 = vpow2.f32 %v2644_v18 }
0x1b1b   :  { %3165 = vtanh.f32 %v1432_v5 }
0x1b24   :  { %v3164_v31 = vpop.eup %3163 }
0x1b25   :  { %v1437_v7 = vadd.f32 1.0, %v3164_v31  ;;  %v3166_v10 = vpop.eup %3165 }
0x1b27   :  { %3167 = vrcp.f32 %v1437_v7 }
0x1b31   :  { %v3168_v59 = vpop.eup %3167 }
0x1b32   :  { %v1440_v15 = vsel %vm3384_vm4, %v3166_v10, %v3168_v59 }
0x1b33   :  { %1446 = vrot.lane.b32.xlu0 %v1440_v15, %s3262_s5  ;;  %v1444_v24 = vmul.f32 %v1442_v42, %v1440_v15 }
0x1ba5   :  { %v1447_v61 = vpop.permute.xlu0 %1446 }
0x1ba6   :  { %v1449_v11 = vmul.f32 %v1447_v61, %v1440_v15 }
0x1ba8   :  { %1451 = vrot.lane.b32.xlu1 %v1449_v11, %s3263_s26 }
0x1c1a   :  { %v1452_v37 = vpop.permute.xlu1 %1451 }
0x1c1b   :  { %v1454_v44 = vadd.f32 %v1452_v37, %v1444_v24 }
0x1c1d   :  { %3169 = vtanh.f32 %v1454_v44  ;;  %v1547_v8 = vrot.slane %v1454_v44, 4 }
0x1c27   :  { %v3170_v20 = vpop.eup %3169 }
0x1c28   :  { %1457 = vrot.lane.b32.xlu0 %v3170_v20, %s3262_s5 }
0x1c9a   :  { %v1458_v25 = vpop.permute.xlu0 %1457 }
0x1c9b   :  { %v1460_v34 = vmul.f32 %v1458_v25, %v1440_v15 }
0x1c9d   :  { %v1462_v36 = vrot.slane %v1460_v34, 4 }
0x1c9f   :  { %1463 = vrot.lane.b32.xlu1 %v1462_v36, %s3263_s26  ;;  %v2353_v53 = vrot.slane %v1462_v36, 1  ;;  %v2099_v55 = vrot.slane %v1462_v36, 7  ;;  %v2477_v17 = vrot.slane %v1462_v36, 2  ;;  %v2229_v3 = vsel %vm2100_vm6, %v1462_v36, %v2228_v57 }
0x1ca1   :  { %v2354_v32 = vsel %vm2100_vm6, %v2353_v53, %v2352_v27  ;;  %v2101_v40 = vsel %vm2100_vm6, %v2099_v55, %v3817_v1  ;;  %v2478_v5 = vsel %vm2100_vm6, %v2477_v17, %v2476_v58  ;;  %vm4012_vm6 = vcmask 1045509  }
0x1d11   :  { %v1464_v46 = vpop.permute.xlu1 %1463 }
0x1d12   :  { %2898 = vmatmul.mubr.msk.f32.vlgmr.msra.gmra.mrb[14].mxu0 %vm262_vm5, %v1464_v46 }
0x1d13   :  { %3049 = vmatpush3.bf16.msra.mxu0 %v3721_v38  ;;  %2919 = vmatprep.mubr.msk.f32.mxu0 %vm3260_vm1, %v3261_v12 }
0x1d14   :  { %3050 = vmatprep.subr.bf16.mxu0 %v3259_v9 }
0x1d17   :  { %3052 = vmatpush3.bf16.msra.mxu0 %v3733_v6 }
0x1d18   :  { %3059 = vmatprep.subr.bf16.mxu0 %v3259_v9 }
0x1de5   :  { %v1533_v35 = vpop.f32.mrb[14].mxu0 }
0x1de6   :  { %v1537_v2 = vadd.f32 %v1533_v35, %v3432_v49  ;;  %v2899_v43 = vpop.f32.mrb[15].mxu0 }
0x1de8   :  { %v2646_v45 = vmul.f32 -1.442695, %v1537_v2 }
0x1dea   :  { %3171 = vpow2.f32 %v2646_v45 }
0x1deb   :  { %3173 = vtanh.f32 %v1537_v2 }
0x1df4   :  { %v3172_v0 = vpop.eup %3171 }
0x1df5   :  { %v1542_v26 = vadd.f32 1.0, %v3172_v0  ;;  %v3174_v21 = vpop.eup %3173 }
0x1df7   :  { %3175 = vrcp.f32 %v1542_v26 }
0x1e01   :  { %v3176_v4 = vpop.eup %3175 }
0x1e02   :  { %v1545_v16 = vsel %vm3384_vm4, %v3174_v21, %v3176_v4 }
0x1e03   :  { %1551 = vrot.lane.b32.xlu0 %v1545_v16, %s3262_s5  ;;  %v1549_v33 = vmul.f32 %v1547_v8, %v1545_v16 }
0x1e75   :  { %v1552_v47 = vpop.permute.xlu0 %1551 }
0x1e76   :  { %v1554_v50 = vmul.f32 %v1552_v47, %v1545_v16 }
0x1e78   :  { %1556 = vrot.lane.b32.xlu1 %v1554_v50, %s3263_s26 }
0x1eea   :  { %v1557_v51 = vpop.permute.xlu1 %1556 }
0x1eeb   :  { %v1559_v63 = vadd.f32 %v1557_v51, %v1549_v33 }
0x1eed   :  { %3177 = vtanh.f32 %v1559_v63  ;;  %v1654_v36 = vrot.slane %v1559_v63, 4 }
0x1ef7   :  { %v3178_v22 = vpop.eup %3177 }
0x1ef8   :  { %1562 = vrot.lane.b32.xlu0 %v3178_v22, %s3262_s5 }
0x1f6a   :  { %v1563_v56 = vpop.permute.xlu0 %1562 }
0x1f6b   :  { %v1565_v28 = vmul.f32 %v1563_v56, %v1545_v16 }
0x1f6d   :  { %v2102_v39 = vrot.slane %v1565_v28, 6  ;;  %v2230_v41 = vrot.slane %v1565_v28, 7  ;;  %v2479_v23 = vrot.slane %v1565_v28, 1  ;;  %1567 = vrot.lane.b32.xlu1 %v1565_v28, %s3263_s26  ;;  %v2355_v48 = vsel %vm2103_vm8, %v1565_v28, %v2354_v32 }
0x1f6f   :  { %v2104_v18 = vsel %vm2103_vm8, %v2102_v39, %v2101_v40  ;;  %v2231_v31 = vsel %vm2103_vm8, %v2230_v41, %v2229_v3  ;;  %v2480_v7 = vsel %vm2103_vm8, %v2479_v23, %v2478_v5  ;;  %vm4014_vm8 = vmmov %vm4012_vm6 }
0x1fdf   :  { %v1568_v10 = vpop.permute.xlu1 %1567 }
0x1fe0   :  { %2909 = vmatmul.mubr.msk.f32.vlgmr.msra.gmra.mrb[14].mxu1 %vm262_vm5, %v1568_v10 }
0x1fe1   :  { %3055 = vmatpush3.bf16.msra.mxu1 %v3721_v38  ;;  %2930 = vmatprep.mubr.msk.f32.mxu1 %vm3260_vm1, %v3261_v12 }
0x1fe2   :  { %3056 = vmatprep.subr.bf16.mxu1 %v3259_v9 }
0x1fe5   :  { %3058 = vmatpush3.bf16.msra.mxu1 %v3733_v6 }
0x1fe6   :  { %3065 = vmatprep.subr.bf16.mxu1 %v3259_v9 }
0x20b3   :  { %v1637_v1 = vpop.f32.mrb[14].mxu1 }
0x20b4   :  { %v1642_v59 = vrot.slane %v1637_v1, 4  ;;  %v2910_v15 = vpop.f32.mrb[15].mxu1 }
0x20b6   :  { %v1644_v61 = vadd.f32 %v1642_v59, %v3432_v49 }
0x20b8   :  { %v2648_v11 = vmul.f32 -1.442695, %v1644_v61 }
0x20ba   :  { %3179 = vpow2.f32 %v2648_v11 }
0x20bb   :  { %3181 = vtanh.f32 %v1644_v61 }
0x20c4   :  { %v3180_v42 = vpop.eup %3179 }
0x20c5   :  { %v1649_v24 = vadd.f32 1.0, %v3180_v42  ;;  %v3182_v37 = vpop.eup %3181 }
0x20c7   :  { %3183 = vrcp.f32 %v1649_v24 }
0x20d1   :  { %v3184_v44 = vpop.eup %3183 }
0x20d2   :  { %v1652_v20 = vsel %vm3384_vm4, %v3182_v37, %v3184_v44 }
0x20d3   :  { %1658 = vrot.lane.b32.xlu0 %v1652_v20, %s3262_s5  ;;  %v1656_v46 = vmul.f32 %v1654_v36, %v1652_v20 }
0x2145   :  { %v1659_v25 = vpop.permute.xlu0 %1658 }
0x2146   :  { %v1661_v34 = vmul.f32 %v1659_v25, %v1652_v20 }
0x2148   :  { %1663 = vrot.lane.b32.xlu1 %v1661_v34, %s3263_s26 }
0x21ba   :  { %v1664_v49 = vpop.permute.xlu1 %1663 }
0x21bb   :  { %v1666_v35 = vadd.f32 %v1664_v49, %v1656_v46 }
0x21bd   :  { %3185 = vtanh.f32 %v1666_v35  ;;  %v1759_v32 = vrot.slane %v1666_v35, 4 }
0x21c7   :  { %v3186_v2 = vpop.eup %3185 }
0x21c8   :  { %1669 = vrot.lane.b32.xlu0 %v3186_v2, %s3262_s5 }
0x223a   :  { %v1670_v43 = vpop.permute.xlu0 %1669 }
0x223b   :  { %v1672_v45 = vmul.f32 %v1670_v43, %v1652_v20 }
0x223d   :  { %v1674_v0 = vrot.slane %v1672_v45, 4 }
0x223f   :  { %v2105_v26 = vrot.slane %v1674_v0, 5  ;;  %v2232_v21 = vrot.slane %v1674_v0, 6  ;;  %v2356_v4 = vrot.slane %v1674_v0, 7  ;;  %1675 = vrot.lane.b32.xlu1 %v1674_v0, %s3263_s26  ;;  %v2481_v16 = vsel %vm2106_vm7, %v1674_v0, %v2480_v7 }
0x2241   :  { %v2107_v47 = vsel %vm2106_vm7, %v2105_v26, %v2104_v18  ;;  %v2233_v50 = vsel %vm2106_vm7, %v2232_v21, %v2231_v31  ;;  %v2357_v8 = vsel %vm2106_vm7, %v2356_v4, %v2355_v48  ;;  %vm4013_vm7 = vmmov %vm4012_vm6 }
0x22b1   :  { %v1676_v33 = vpop.permute.xlu1 %1675 }
0x22b2   :  { %2920 = vmatmul.mubr.msk.f32.vlgmr.msra.gmra.mrb[16].mxu0 %vm262_vm5, %v1676_v33 }
0x22b3   :  { %3061 = vmatpush3.bf16.msra.mxu0 %v3721_v38  ;;  %2941 = vmatprep.mubr.msk.f32.mxu0 %vm3260_vm1, %v3261_v12 }
0x22b4   :  { %3062 = vmatprep.subr.bf16.mxu0 %v3259_v9 }
0x22b7   :  { %3064 = vmatpush3.bf16.msra.mxu0 %v3733_v6 }
0x22b8   :  { %2955 = vmatprep.subr.mxu0 %v3261_v12 }
0x2385   :  { %v1745_v51 = vpop.f32.mrb[16].mxu0 }
0x2386   :  { %v1749_v63 = vadd.f32 %v1745_v51, %v3440_v54  ;;  %v2921_v22 = vpop.f32.mrb[17].mxu0 }
0x2388   :  { %v2650_v53 = vmul.f32 -1.442695, %v1749_v63 }
0x238a   :  { %3187 = vpow2.f32 %v2650_v53 }
0x238b   :  { %3189 = vtanh.f32 %v1749_v63 }
0x2394   :  { %v3188_v27 = vpop.eup %3187 }
0x2395   :  { %v1754_v55 = vadd.f32 1.0, %v3188_v27  ;;  %v3190_v17 = vpop.eup %3189 }
0x2397   :  { %3191 = vrcp.f32 %v1754_v55 }
0x23a1   :  { %v3192_v56 = vpop.eup %3191 }
0x23a2   :  { %v1757_v28 = vsel %vm3384_vm4, %v3190_v17, %v3192_v56 }
0x23a3   :  { %1763 = vrot.lane.b32.xlu0 %v1757_v28, %s3262_s5  ;;  %v1761_v39 = vmul.f32 %v1759_v32, %v1757_v28 }
0x2415   :  { %v1764_v57 = vpop.permute.xlu0 %1763 }
0x2416   :  { %v1766_v58 = vmul.f32 %v1764_v57, %v1757_v28 }
0x2418   :  { %1768 = vrot.lane.b32.xlu1 %v1766_v58, %s3263_s26 }
0x248a   :  { %v1769_v41 = vpop.permute.xlu1 %1768 }
0x248b   :  { %v1771_v23 = vadd.f32 %v1769_v41, %v1761_v39 }
0x248d   :  { %3193 = vtanh.f32 %v1771_v23  ;;  %v1866_v46 = vrot.slane %v1771_v23, 4 }
0x2497   :  { %v3194_v48 = vpop.eup %3193 }
0x2498   :  { %1774 = vrot.lane.b32.xlu0 %v3194_v48, %s3262_s5 }
0x250a   :  { %v1775_v3 = vpop.permute.xlu0 %1774 }
0x250b   :  { %v1777_v40 = vmul.f32 %v1775_v3, %v1757_v28 }
0x250d   :  { %1779 = vrot.lane.b32.xlu1 %v1777_v40, %s3263_s26  ;;  %v2108_v5 = vrot.slane %v1777_v40, 4  ;;  %v2234_v18 = vrot.slane %v1777_v40, 5  ;;  %v2358_v31 = vrot.slane %v1777_v40, 6  ;;  %v2482_v7 = vrot.slane %v1777_v40, 7 }
0x250f   :  { %v2110_v10 = vsel %vm2109_vm9, %v2108_v5, %v2107_v47  ;;  %v2235_v1 = vsel %vm2109_vm9, %v2234_v18, %v2233_v50  ;;  %v2359_v59 = vsel %vm2109_vm9, %v2358_v31, %v2357_v8  ;;  %v2483_v15 = vsel %vm2109_vm9, %v2482_v7, %v2481_v16  ;;  %vm4015_vm9 = vmmov %vm4012_vm6 }
0x257f   :  { %v1780_v61 = vpop.permute.xlu1 %1779 }
0x2580   :  { %2931 = vmatmul.mubr.msk.f32.vlgmr.msra.gmra.mrb[16].mxu1 %vm262_vm5, %v1780_v61 }
0x2581   :  { %3067 = vmatpush3.bf16.msra.mxu1 %v3721_v38  ;;  %2952 = vmatprep.mubr.msk.f32.mxu1 %vm3260_vm1, %v3261_v12 }
0x2582   :  { %3068 = vmatprep.subr.bf16.mxu1 %v3259_v9 }
0x2585   :  { %3070 = vmatpush3.bf16.msra.mxu1 %v3733_v6 }
0x2586   :  { %2960 = vmatprep.subr.mxu1 %v3261_v12 }
0x2653   :  { %v1849_v11 = vpop.f32.mrb[16].mxu1 }
0x2654   :  { %v1854_v42 = vrot.slane %v1849_v11, 4  ;;  %v2932_v24 = vpop.f32.mrb[17].mxu1 }
0x2656   :  { %v1856_v37 = vadd.f32 %v1854_v42, %v3440_v54 }
0x2658   :  { %v2652_v44 = vmul.f32 -1.442695, %v1856_v37 }
0x265a   :  { %3195 = vpow2.f32 %v2652_v44 }
0x265b   :  { %3197 = vtanh.f32 %v1856_v37 }
0x2664   :  { %v3196_v20 = vpop.eup %3195 }
0x2665   :  { %v1861_v25 = vadd.f32 1.0, %v3196_v20  ;;  %v3198_v38 = vpop.eup %3197 }
0x2667   :  { %3199 = vrcp.f32 %v1861_v25 }
0x2671   :  { %v3200_v34 = vpop.eup %3199 }
0x2672   :  { %v1864_v9 = vsel %vm3384_vm4, %v3198_v38, %v3200_v34 }
0x2673   :  { %1870 = vrot.lane.b32.xlu0 %v1864_v9, %s3262_s5  ;;  %v1868_v49 = vmul.f32 %v1866_v46, %v1864_v9 }
0x26e5   :  { %v1871_v6 = vpop.permute.xlu0 %1870 }
0x26e6   :  { %v1873_v36 = vmul.f32 %v1871_v6, %v1864_v9 }
0x26e8   :  { %1875 = vrot.lane.b32.xlu1 %v1873_v36, %s3263_s26 }
0x275a   :  { %v1876_v54 = vpop.permute.xlu1 %1875 }
0x275b   :  { %v1878_v35 = vadd.f32 %v1876_v54, %v1868_v49 }
0x275d   :  { %3201 = vtanh.f32 %v1878_v35  ;;  %v1971_v39 = vrot.slane %v1878_v35, 4 }
0x2767   :  { %v3202_v2 = vpop.eup %3201 }
0x2768   :  { %1881 = vrot.lane.b32.xlu0 %v3202_v2, %s3262_s5 }
0x27da   :  { %v1882_v43 = vpop.permute.xlu0 %1881 }
0x27db   :  { %v1884_v45 = vmul.f32 %v1882_v43, %v1864_v9  ;;  %v2582_v43 = vrot.slane %v3621_v19, 3 }
0x27dd   :  { %v1886_v0 = vrot.slane %v1884_v45, 4 }
0x27df   :  { %1887 = vrot.lane.b32.xlu1 %v1886_v0, %s3263_s26  ;;  %v2111_v26 = vrot.slane %v1886_v0, 3  ;;  %v2236_v21 = vrot.slane %v1886_v0, 4  ;;  %v2360_v4 = vrot.slane %v1886_v0, 5  ;;  %v2484_v16 = vrot.slane %v1886_v0, 6 }
0x27e1   :  { %v2113_v47 = vsel %vm4012_vm6, %v2111_v26, %v2110_v10  ;;  %v2237_v50 = vsel %vm4013_vm7, %v2236_v21, %v2235_v1  ;;  %v2361_v8 = vsel %vm4014_vm8, %v2360_v4, %v2359_v59  ;;  %v2485_v33 = vsel %vm4015_vm9, %v2484_v16, %v2483_v15 }
0x2851   :  { %v1888_v51 = vpop.permute.xlu1 %1887 }
0x2852   :  { %2942 = vmatmul.mubr.msk.f32.vlgmr.msra.gmra.mrb[18].mxu0 %vm262_vm5, %v1888_v51 }
0x2853   :  { %2957 = vmatprep.mubr.msk.f32.mxu0 %vm3260_vm1, %v3261_v12 }
0x2925   :  { %v1957_v63 = vpop.f32.mrb[18].mxu0 }
0x2926   :  { %v1961_v22 = vadd.f32 %v1957_v63, %v3437_v52  ;;  %v2943_v53 = vpop.f32.mrb[19].mxu0 }
0x2928   :  { %v2654_v27 = vmul.f32 -1.442695, %v1961_v22 }
0x292a   :  { %3203 = vpow2.f32 %v2654_v27 }
0x292b   :  { %3205 = vtanh.f32 %v1961_v22 }
0x2934   :  { %v3204_v55 = vpop.eup %3203 }
0x2935   :  { %v1966_v17 = vadd.f32 1.0, %v3204_v55  ;;  %v3206_v56 = vpop.eup %3205  ;;  %v2213_v55 = vstv %s3072_s7 }
0x2937   :  { %3207 = vrcp.f32 %v1966_v17 }
0x2941   :  { %v3208_v28 = vpop.eup %3207 }
0x2942   :  { %v1969_v57 = vsel %vm3384_vm4, %v3206_v56, %v3208_v28 }
0x2943   :  { %1975 = vrot.lane.b32.xlu0 %v1969_v57, %s3262_s5  ;;  %v1973_v41 = vmul.f32 %v1971_v39, %v1969_v57 }
0x29b5   :  { %v1976_v58 = vpop.permute.xlu0 %1975 }
0x29b6   :  { %v1978_v32 = vmul.f32 %v1976_v58, %v1969_v57 }
0x29b8   :  { %1980 = vrot.lane.b32.xlu1 %v1978_v32, %s3263_s26 }
0x2a2a   :  { %v1981_v23 = vpop.permute.xlu1 %1980 }
0x2a2b   :  { %v1983_v48 = vadd.f32 %v1981_v23, %v1973_v41 }
0x2a2d   :  { %3209 = vtanh.f32 %v1983_v48 }
0x2a37   :  { %v3210_v3 = vpop.eup %3209 }
0x2a38   :  { %1986 = vrot.lane.b32.xlu0 %v3210_v3, %s3262_s5 }
0x2aaa   :  { %v1987_v40 = vpop.permute.xlu0 %1986 }
0x2aab   :  { %v1989_v5 = vmul.f32 %v1987_v40, %v1969_v57 }
0x2aad   :  { %1991 = vrot.lane.b32.xlu1 %v1989_v5, %s3263_s26  ;;  %v2114_v18 = vrot.slane %v1989_v5, 2  ;;  %v2238_v31 = vrot.slane %v1989_v5, 3  ;;  %v2362_v7 = vrot.slane %v1989_v5, 4  ;;  %v2486_v10 = vrot.slane %v1989_v5, 5 }
0x2aaf   :  { %v2116_v1 = vsel %vm2115_vm14, %v2114_v18, %v2113_v47  ;;  %v2239_v59 = vsel %vm2115_vm14, %v2238_v31, %v2237_v50  ;;  %v2363_v15 = vsel %vm2115_vm14, %v2362_v7, %v2361_v8  ;;  %v2487_v61 = vsel %vm2115_vm14, %v2486_v10, %v2485_v33 }
0x2b1f   :  { %v1992_v11 = vpop.permute.xlu1 %1991 }
0x2b20   :  { %2953 = vmatmul.mubr.msk.f32.vlgmr.msra.gmra.mrb[18].mxu1 %vm262_vm5, %v1992_v11 }
0x2b21   :  { %2962 = vmatprep.mubr.msk.f32.mxu1 %vm3260_vm1, %v3261_v12 }
0x2bf3   :  { %v2061_v42 = vpop.f32.mrb[18].mxu1 }
0x2bf4   :  { %v2066_v24 = vrot.slane %v2061_v42, 4  ;;  %v2954_v37 = vpop.f32.mrb[19].mxu1 }
0x2bf6   :  { %v2068_v44 = vadd.f32 %v2066_v24, %v3437_v52  ;;  %v2078_v52 = vrot.slane %v1983_v48, 4 }
0x2bf8   :  { %v2656_v20 = vmul.f32 -1.442695, %v2068_v44 }
0x2bfa   :  { %3211 = vpow2.f32 %v2656_v20 }
0x2bfb   :  { %3213 = vtanh.f32 %v2068_v44 }
0x2c04   :  { %v3212_v25 = vpop.eup %3211 }
0x2c05   :  { %v2073_v38 = vadd.f32 1.0, %v3212_v25  ;;  %v3214_v34 = vpop.eup %3213 }
0x2c07   :  { %3215 = vrcp.f32 %v2073_v38 }
0x2c11   :  { %v3216_v9 = vpop.eup %3215 }
0x2c12   :  { %v2076_v6 = vsel %vm3384_vm4, %v3214_v34, %v3216_v9 }
0x2c13   :  { %2082 = vrot.lane.b32.xlu0 %v2076_v6, %s3262_s5  ;;  %v2080_v49 = vmul.f32 %v2078_v52, %v2076_v6 }
0x2c85   :  { %v2083_v36 = vpop.permute.xlu0 %2082 }
0x2c86   :  { %v2085_v46 = vmul.f32 %v2083_v36, %v2076_v6 }
0x2c88   :  { %2087 = vrot.lane.b32.xlu1 %v2085_v46, %s3263_s26 }
0x2c8c   :  { %2136 = vrot.lane.b32.xlu1 %v3761_v62, %s3263_s26  ;;  %v2334_v62 = vrot.slane %v3621_v19, 1 }
0x2c8e   :  { %3073 = vpush %v2334_v62 }
0x2c90   :  { %2382 = vrot.lane.b32.xlu1 %v3764_v60, %s3263_s26  ;;  %v2458_v60 = vrot.slane %v3621_v19, 2 }
0x2c92   :  { %3075 = vpush %v2458_v60 }
0x2c93   :  { %3077 = vpush %v2582_v43 }
0x2cbf   :  { %s3074_s24 = spop %3073 }
0x2cc0   :  { %v2336_v17 = vstv %s3074_s24 }
0x2cc1   :  { %vm2337_vm4 = vcmp.lt.s32.totalorder %v3380_v29, %v2336_v17 }
0x2cc3   :  { %s3076_s25 = spop %3075 }
0x2cc4   :  { %s3078_s1 = spop %3077  ;;  %v2460_v56 = vstv %s3076_s25 }
0x2cc5   :  { %v2584_v28 = vstv %s3078_s1  ;;  %vm2461_vm2 = vcmp.lt.s32.totalorder %v3380_v29, %v2460_v56 }
0x2cc6   :  { %vm2585_vm10 = vcmp.lt.s32.totalorder %v3380_v29, %v2584_v28 }
0x2cfa   :  { %v2088_v54 = vpop.permute.xlu1 %2087 }
0x2cfb   :  { %v2090_v35 = vadd.f32 %v2088_v54, %v2080_v49 }
0x2cfd   :  { %3217 = vtanh.f32 %v2090_v35 }
0x2cfe   :  { %v2137_v2 = vpop.permute.xlu1 %2136 }
0x2cff   :  { %2956 = vmatpush3.xpose.msk.msra.mxu0 %vm262_vm5, %v2137_v2 }
0x2d00   :  { %2965 = vmatprep.subr.mxu0 %v3261_v12 }
0x2d02   :  { %v2383_v33 = vpop.permute.xlu1 %2382 }
0x2d07   :  { %v3218_v30 = vpop.eup %3217 }
0x2d08   :  { %2093 = vrot.lane.b32.xlu0 %v3218_v30, %s3262_s5  ;;  %s2605_s5 = sshll.u32 %s3266_s4, 4  ;;  %s2606_s5 = int_to_ptr.vmem [resolvable:$true] %s2605_s5 }
0x2d09   :  { %p3240_p1 = scmp.lt.s32.totalorder %s2606_s5, %s2606_s5 }
0x2d0c   :  { %2258 = vrot.lane.b32.xlu0 %v3767_v13, %s3263_s26 }
0x2d10   :  { %2506 = vrot.lane.b32.xlu0 %v3774_v14, %s3263_s26 }
0x2d7a   :  { %v2094_v45 = vpop.permute.xlu0 %2093 }
0x2d7b   :  { %v2096_v0 = vmul.f32 %v2094_v45, %v2076_v6 }
0x2d7d   :  { %v2098_v26 = vrot.slane %v2096_v0, 4 }
0x2d7e   :  { %v2259_v21 = vpop.permute.xlu0 %2258 }
0x2d7f   :  { %2961 = vmatpush3.xpose.msk.msra.mxu1 %vm262_vm5, %v2259_v21  ;;  %v2117_v4 = vrot.slane %v2098_v26, 1  ;;  %v2240_v13 = vrot.slane %v2098_v26, 2  ;;  %v2364_v47 = vrot.slane %v2098_v26, 3  ;;  %v2488_v50 = vrot.slane %v2098_v26, 4 }
0x2d80   :  { %2970 = vmatprep.subr.mxu1 %v3261_v12 }
0x2d81   :  { %v2119_v14 = vsel %vm2118_vm0, %v2117_v4, %v2116_v1  ;;  %v2241_v16 = vsel %vm2118_vm0, %v2240_v13, %v2239_v59  ;;  %v2365_v19 = vsel %vm2118_vm0, %v2364_v47, %v2363_v15  ;;  %v2489_v8 = vsel %vm2118_vm0, %v2488_v50, %v2487_v61 }
0x2d82   :  { %2120 = vrot.lane.b32.xlu1 %v2119_v14, %s3263_s26  ;;  %2242 = vrot.lane.b32.xlu0 %v2241_v16, %s3263_s26  ;;  %v2507_v51 = vpop.permute.xlu0 %2506  ;;  %vm2214_vm0 = vcmp.lt.s32.totalorder %v3380_v29, %v2213_v55 }
0x2d86   :  { %2366 = vrot.lane.b32.xlu1 %v2365_v19, %s3263_s26  ;;  %2490 = vrot.lane.b32.xlu0 %v2489_v8, %s3263_s26  ;;  %s3235_s26 = scalar_lea.vmem %s2606_s5, 512 }
0x2d87   :  { %p3236_p0 = scmp.ne.s32.totalorder %s2606_s5, %s3235_s26  ;;  %p3241_p2 = scmp.lt.s32.totalorder %s3235_s26, %s3235_s26 }
0x2d89   :  { %p3242_p3 = por %p3241_p2, %p3240_p1 }
0x2d8b   :  { %p3243_p4 = pnand %p3242_p3, %p3236_p0 }
0x2df4   :  { %v2121_v63 = vpop.permute.xlu1 %2120  ;;  %v2243_v22 = vpop.permute.xlu0 %2242 }
0x2df5   :  { %2958 = vmatmul.mubr.msk.f32.vlgmr.msra.gmra.mrb[20].mxu0 %vm262_vm5, %v2121_v63  ;;  %2963 = vmatmul.mubr.msk.f32.vlgmr.msra.gmra.mrb[20].mxu1 %vm262_vm5, %v2243_v22 }
0x2df6   :  { %2966 = vmatpush3.xpose.msk.msra.mxu0 %vm262_vm5, %v2383_v33  ;;  %2971 = vmatpush3.xpose.msk.msra.mxu1 %vm262_vm5, %v2507_v51 }
0x2df7   :  { %2967 = vmatprep.mubr.msk.f32.mxu0 %vm3260_vm1, %v3261_v12  ;;  %2972 = vmatprep.mubr.msk.f32.mxu1 %vm3260_vm1, %v3261_v12  ;;  %vm4016_vm1 = vcmask 64512  }
0x2df8   :  { %v2367_v53 = vpop.permute.xlu1 %2366  ;;  %v2491_v27 = vpop.permute.xlu0 %2490  ;;  %vm4018_vm3 = vmmov %vm4016_vm1 }
0x2df9   :  { %2968 = vmatmul.mubr.msk.f32.vlgmr.msra.gmra.mrb[22].mxu0 %vm262_vm5, %v2367_v53  ;;  %2973 = vmatmul.mubr.msk.f32.vlgmr.msra.gmra.mrb[22].mxu1 %vm262_vm5, %v2491_v27  ;;  %vm4017_vm5 = vmmov %vm4016_vm1 }
0x2dfa   :  { %vm4019_vm12 = vmmov %vm4016_vm1 }
0x2dfb   :  { %vm4020_vm11 = vmmov %vm4016_vm1 }
0x2dfc   :  { %vm4021_vm13 = vmmov %vm4016_vm1 }
0x2dfd   :  { %vm4022_vm15 = vmmov %vm4016_vm1 }
0x2dfe   :  { %vm4023_vm14 = vmmov %vm4016_vm1 }
0x2dff   :  { %vm4024_vm6 = vmmov %vm4016_vm1 }
0x2e00   :  { %vm4025_vm7 = vmmov %vm4016_vm1 }
0x2e01   :  { %vm4026_vm8 = vmmov %vm4016_vm1 }
0x2e02   :  { %vm4027_vm9 = vmmov %vm4016_vm1 }
0x2ec8   :  { %v2208_v57 = vpop.f32.mrb[20].mxu0  ;;  %v2330_v12 = vpop.f32.mrb[20].mxu1 }
0x2ec9   :  { %v2215_v58 = vsel %vm2214_vm0, %v2208_v57, -1e+30  ;;  %v2338_v32 = vsel %vm2337_vm4, %v2330_v12, -1e+30  ;;  %v2959_v39 = vpop.f32.mrb[21].mxu0  ;;  %v2964_v41 = vpop.f32.mrb[21].mxu1 }
0x2eca   :  { %v2216_v23 = vsel %vm4016_vm1, %v2215_v58, -inf  ;;  %v2339_v48 = vsel %vm4017_vm5, %v2338_v32, -inf }
0x2ecb   :  { %2217 = vmax.xlane.f32.xlu1 %v2216_v23  ;;  %2340 = vmax.xlane.f32.xlu0 %v2339_v48 }
0x2ecc   :  { %v2454_v3 = vpop.f32.mrb[22].mxu0  ;;  %v2578_v40 = vpop.f32.mrb[22].mxu1 }
0x2ecd   :  { %v2462_v5 = vsel %vm2461_vm2, %v2454_v3, -1e+30  ;;  %v2586_v18 = vsel %vm2585_vm10, %v2578_v40, -1e+30  ;;  %v2969_v31 = vpop.f32.mrb[23].mxu0  ;;  %v2974_v7 = vpop.f32.mrb[23].mxu1 }
0x2ece   :  { %v2463_v10 = vsel %vm4018_vm3, %v2462_v5, -inf  ;;  %v2587_v1 = vsel %vm4019_vm12, %v2586_v18, -inf }
0x2ecf   :  { %2464 = vmax.xlane.f32.xlu0 %v2463_v10  ;;  %2588 = vmax.xlane.f32.xlu1 %v2587_v1 }
0x2f58   :  { %v2218_v59 = vpop.xlane.xlu1 %2217  ;;  %v2341_v15 = vpop.xlane.xlu0 %2340 }
0x2f59   :  { %v2219_v61 = vsub.f32 %v2215_v58, %v2218_v59  ;;  %v2342_v11 = vsub.f32 %v2338_v32, %v2341_v15 }
0x2f5b   :  { %v2220_v42 = vmul.f32 1.442695, %v2219_v61  ;;  %v2343_v29 = vmul.f32 1.442695, %v2342_v11 }
0x2f5c   :  { %v2589_v24 = vpop.xlane.xlu1 %2588  ;;  %v2465_v37 = vpop.xlane.xlu0 %2464 }
0x2f5d   :  { %3219 = vpow2.f32 %v2220_v42  ;;  %v2590_v44 = vsub.f32 %v2586_v18, %v2589_v24  ;;  %v2466_v20 = vsub.f32 %v2462_v5, %v2465_v37 }
0x2f5e   :  { %3221 = vpow2.f32 %v2343_v29 }
0x2f5f   :  { %v2591_v25 = vmul.f32 1.442695, %v2590_v44  ;;  %v2467_v38 = vmul.f32 1.442695, %v2466_v20 }
0x2f61   :  { %3223 = vpow2.f32 %v2591_v25 }
0x2f62   :  { %3225 = vpow2.f32 %v2467_v38 }
0x2f67   :  { %v3220_v34 = vpop.eup %3219 }
0x2f68   :  { %v3222_v9 = vpop.eup %3221  ;;  %v2222_v6 = vsel %vm4020_vm11, %v3220_v34, 0.0 }
0x2f69   :  { %2223 = vadd.xlane.f32.xlu0 %v2222_v6  ;;  %v2345_v36 = vsel %vm4021_vm13, %v3222_v9, 0.0 }
0x2f6a   :  { %2346 = vadd.xlane.f32.xlu1 %v2345_v36 }
0x2f6b   :  { %v3224_v46 = vpop.eup %3223 }
0x2f6c   :  { %v3226_v52 = vpop.eup %3225  ;;  %v2593_v49 = vsel %vm4022_vm15, %v3224_v46, 0.0 }
0x2f6d   :  { %v2469_v54 = vsel %vm4023_vm14, %v3226_v52, 0.0 }
0x2f6e   :  { %2594 = vadd.xlane.f32.xlu1 %v2593_v49  ;;  %2470 = vadd.xlane.f32.xlu0 %v2469_v54 }
0x2ff6   :  { %v2224_v35 = vpop.xlane.xlu0 %2223 }
0x2ff7   :  { %v2347_v2 = vpop.xlane.xlu1 %2346  ;;  %3227 = vrcp.f32 %v2224_v35 }
0x2ff8   :  { %3229 = vrcp.f32 %v2347_v2 }
0x2ffb   :  { %v2595_v30 = vpop.xlane.xlu1 %2594  ;;  %v2471_v62 = vpop.xlane.xlu0 %2470 }
0x2ffc   :  { %3231 = vrcp.f32 %v2595_v30 }
0x2ffd   :  { %3233 = vrcp.f32 %v2471_v62 }
0x3001   :  { %v3228_v60 = vpop.eup %3227 }
0x3002   :  { %v3230_v43 = vpop.eup %3229  ;;  %v2226_v45 = vmul.f32 %v3228_v60, %v3220_v34 }
0x3003   :  { %v2349_v0 = vmul.f32 %v3230_v43, %v3222_v9 }
0x3004   :  { %2227 = vst.msk [vmem:[#allocation2] sm:$0xff] %vm4024_vm6, %v2226_v45 }
0x3005   :  { %2351 = vst.msk [vmem:[#allocation2 + $0x8] sm:$0xff] %vm4025_vm7, %v2349_v0 }
0x3006   :  { %v3232_v26 = vpop.eup %3231 }
0x3007   :  { %v3234_v21 = vpop.eup %3233  ;;  %v2597_v4 = vmul.f32 %v3232_v26, %v3224_v46 }
0x3008   :  { %v2473_v13 = vmul.f32 %v3234_v21, %v3226_v52 }
0x3009   :  { %2599 = vst.msk [vmem:[#allocation2 + $0x18] sm:$0xff] %vm4026_vm8, %v2597_v4 }
0x300a   :  { %2475 = vst.msk [vmem:[#allocation2 + $0x10] sm:$0xff] %vm4027_vm9, %v2473_v13 }
0x300b   :  { %3246 = shalt.err (!%p3243_p4)
}
0x300c   :  { %s3247_s29 = scalar_lea.hbm %s4007_s9, 512 }
0x300d   :  { %p3248_p5 = scmp.ne.s32.totalorder %s4007_s9, %s3247_s29  ;;  %p3251_p6 = scmp.lt.u32.totalorder %s3247_s29, %s4007_s9 }
0x300f   :  { %p3253_p7 = pnand %p3251_p6, %p3248_p5 }
0x3011   :  { %3256 = shalt.err (!%p3253_p7)
}
0x3012   :  { %s3267_s13 = smov 128   ;;  %s3268_s6 = smov 8  }
0x3013   :  { %2611 = dma.vmem_to_hbm [thread:$0]  %s2606_s5, 512, %s4007_s9, [#allocation3], %s3267_s13, %s3267_s13, %s3268_s6  }
0x3014   :  { %3257 = dma.done.wait [#allocation3], 512  }
0x3015   :  { %3258 = vsyncadd [#allocation3], 4294966784 }
0x3016   :  { %2615 = vsyncpa [#allocation3], 1 }

</bundles_post_ra>
